<compile_context>
chip_gen: v6e
topology: v6e:2x2x1
jax: 0.10.0
libtpu: 0.0.40
codegen_flags: <defaults>
</compile_context>

<pallas_src>
import functools

import jax
import jax.numpy as jnp
from jax.experimental import pallas as pl
from jax.experimental.pallas import tpu as pltpu

FEATURES4TREE = 16                    # stand-in for data.features4tree
_VMEM_LIMIT = 32 * 1024 * 1024        # safe on v5e / v6e / v7x
_TILE_M = 512                         # im2col rows per grid step (conv matmuls)
_TILE_B = 256                         # images per grid step (fused head kernel)


# ---------------------------------------------------------------------------
# Pallas kernels
# ---------------------------------------------------------------------------
def _matmul_bias_kernel(a_ref, b_ref, bias_ref, o_ref, *, apply_relu):
    """One (TILE_M, K) x (K, Cout) MXU tile: bf16 inputs, f32 accumulate."""
    acc = jnp.dot(a_ref[...], b_ref[...], preferred_element_type=jnp.float32)
    acc = acc + bias_ref[...]
    if apply_relu:
        acc = jnp.maximum(acc, 0.0)
    o_ref[...] = acc.astype(o_ref.dtype)


def matmul_bias(a, b, bias, *, apply_relu, out_dtype, tile_m=_TILE_M):
    """out = a @ b + bias (optional ReLU).  a:(M,K), b:(K,Cout), bias:(Cout,).

    The M axis (rows of the im2col matrix) is tiled so the Pallas auto-pipeline
    double-buffers HBM->VMEM DMAs and the grid axis can be sharded across
    TensorCores on v7x.
    """
    M, K = a.shape
    K2, Cout = b.shape
    assert K == K2
    a = a.astype(jnp.bfloat16)
    b = b.astype(jnp.bfloat16)
    bias2d = bias.reshape(1, Cout).astype(jnp.float32)

    tm = M if M <= tile_m else tile_m          # small M -> single full block
    grid = (pl.cdiv(M, tm),)
    kernel = functools.partial(_matmul_bias_kernel, apply_relu=apply_relu)
    return pl.pallas_call(
        kernel,
        out_shape=jax.ShapeDtypeStruct((M, Cout), out_dtype),
        grid=grid,
        in_specs=[
            pl.BlockSpec((tm, K), lambda i: (i, 0)),
            pl.BlockSpec((K, Cout), lambda i: (0, 0)),
            pl.BlockSpec((1, Cout), lambda i: (0, 0)),
        ],
        out_specs=pl.BlockSpec((tm, Cout), lambda i: (i, 0)),
        compiler_params=pltpu.CompilerParams(
            dimension_semantics=("parallel",),
            vmem_limit_bytes=_VMEM_LIMIT,
        ),
    )(a, b, bias2d)


def _conv_pool_linear_kernel(col_ref, w4_ref, b4_ref, wl_ref, bl_ref, o_ref,
                             *, spatial):
    """Fused conv4 + ReLU + AdaptiveAvgPool2d(1) + Linear for one batch tile.

    col_ref is (spatial, TB, K): the per-image average pool is then a plain
    sum over `spatial` contiguous (TB, Cout) products (no strided slices).
    """
    pooled = None
    for s in range(spatial):                       # static unroll (spatial == 4)
        h = jnp.dot(col_ref[s], w4_ref[...], preferred_element_type=jnp.float32)
        h = jnp.maximum(h + b4_ref[...], 0.0)
        pooled = h if pooled is None else pooled + h
    pooled = pooled * (1.0 / spatial)
    out = jnp.dot(pooled.astype(wl_ref.dtype), wl_ref[...],
                  preferred_element_type=jnp.float32)
    o_ref[...] = (out + bl_ref[...]).astype(o_ref.dtype)


def conv_pool_linear(col_s, w4m, b4, wlm, bl, *, tile_b=_TILE_B):
    """col_s:(S, N, K); w4m:(K, C4); wlm:(C4, F).  Returns (N, F) f32."""
    S, N, K = col_s.shape
    C4 = w4m.shape[1]
    F = wlm.shape[1]
    b4_2d = b4.reshape(1, C4).astype(jnp.float32)
    bl_2d = bl.reshape(1, F).astype(jnp.float32)

    tb = N if N <= tile_b else tile_b
    grid = (pl.cdiv(N, tb),)
    kernel = functools.partial(_conv_pool_linear_kernel, spatial=S)
    return pl.pallas_call(
        kernel,
        out_shape=jax.ShapeDtypeStruct((N, F), jnp.float32),
        grid=grid,
        in_specs=[
            pl.BlockSpec((S, tb, K), lambda i: (0, i, 0)),
            pl.BlockSpec((K, C4), lambda i: (0, 0)),
            pl.BlockSpec((1, C4), lambda i: (0, 0)),
            pl.BlockSpec((C4, F), lambda i: (0, 0)),
            pl.BlockSpec((1, F), lambda i: (0, 0)),
        ],
        out_specs=pl.BlockSpec((tb, F), lambda i: (i, 0)),
        compiler_params=pltpu.CompilerParams(
            dimension_semantics=("parallel",),
            vmem_limit_bytes=_VMEM_LIMIT,
        ),
    )(col_s.astype(jnp.bfloat16), w4m.astype(jnp.bfloat16), b4_2d,
      wlm.astype(jnp.bfloat16), bl_2d)


# ---------------------------------------------------------------------------
# JAX glue: NHWC im2col + conv wrapper (fused by jit around the pallas_calls)
# ---------------------------------------------------------------------------
def im2col_nhwc(x, kh, kw, stride, pad):
    """x:(N,H,W,C) NHWC -> (N, Ho*Wo, kh*kw*C) patches, order (kh, kw, C)."""
    N, H, W, C = x.shape
    xp = jnp.pad(x, ((0, 0), (pad, pad), (pad, pad), (0, 0)))
    Ho = (H + 2 * pad - kh) // stride + 1
    Wo = (W + 2 * pad - kw) // stride + 1
    cols = []
    for i in range(kh):
        for j in range(kw):
            cols.append(xp[:, i:i + stride * Ho:stride, j:j + stride * Wo:stride, :])
    col = jnp.stack(cols, axis=3)                       # (N, Ho, Wo, kh*kw, C)
    return col.reshape(N, Ho * Wo, kh * kw * C), Ho, Wo


def torch_conv_weight_to_matmul(w):
    """(Cout, Cin, kh, kw) torch layout -> (kh*kw*Cin, Cout) NHWC matmul layout."""
    Cout = w.shape[0]
    return jnp.transpose(w, (2, 3, 1, 0)).reshape(-1, Cout)


def conv2d_nhwc(x, w, b, *, stride, pad, apply_relu=True, out_dtype=jnp.bfloat16):
    """PyTorch-equivalent Conv2d on NHWC activations, w in torch layout."""
    N = x.shape[0]
    Cout, Cin, kh, kw = w.shape
    col, Ho, Wo = im2col_nhwc(x, kh, kw, stride, pad)   # (N, Ho*Wo, K)
    col = col.reshape(N * Ho * Wo, kh * kw * Cin)
    w2 = torch_conv_weight_to_matmul(w)                 # (K, Cout)
    out = matmul_bias(col, w2, b, apply_relu=apply_relu, out_dtype=out_dtype)
    return out.reshape(N, Ho, Wo, Cout)                 # stays NHWC


# ---------------------------------------------------------------------------
# Model: deterministic parameter init + forward
# ---------------------------------------------------------------------------
def init_params(key, features4tree=FEATURES4TREE):
    def layer_init(k, w_shape, fan_in):
        bound = 1.0 / (fan_in ** 0.5)
        kw_, kb_ = jax.random.split(k)
        w = jax.random.uniform(kw_, w_shape, jnp.float32, -bound, bound)
        b = jax.random.uniform(kb_, (w_shape[0],), jnp.float32, -bound, bound)
        return w, b

    k1, k2, k3, k4, k5 = jax.random.split(key, 5)
    return {
        "conv1": layer_init(k1, (8, 1, 5, 5), 1 * 5 * 5),
        "conv2": layer_init(k2, (16, 8, 3, 3), 8 * 3 * 3),
        "conv3": layer_init(k3, (32, 16, 3, 3), 16 * 3 * 3),
        "conv4": layer_init(k4, (32, 32, 3, 3), 32 * 3 * 3),
        "linear": layer_init(k5, (features4tree, 32), 32),   # torch (F, in)
    }


def entire_network_forward(params, x):
    """x: (N, 784) flattened 28x28 inputs (Lambda(square_data) in the ref)."""
    N = x.shape[0]
    h = x.reshape(N, 28, 28, 1)                                   # NHWC
    h = conv2d_nhwc(h, *params["conv1"], stride=2, pad=2)         # (N,14,14, 8)
    h = conv2d_nhwc(h, *params["conv2"], stride=2, pad=1)         # (N, 7, 7,16)
    h = conv2d_nhwc(h, *params["conv3"], stride=2, pad=1)         # (N, 4, 4,32)

    # conv4 + ReLU + AdaptiveAvgPool2d(1) + flatten + Linear, fused in one kernel.
    w4, b4 = params["conv4"]
    col4, _, _ = im2col_nhwc(h, 3, 3, stride=2, pad=1)            # (N, 4, 288)
    col4 = jnp.transpose(col4, (1, 0, 2))                         # (S=4, N, 288)
    w4m = torch_conv_weight_to_matmul(w4)                         # (288, 32)
    wl, bl = params["linear"]                                     # torch (F, 32)
    features = conv_pool_linear(col4, w4m, b4, wl.T, bl)          # (N, F)

    # TODO(synk): the Forest class is not defined in the reference module, so
    # the forest routing / pi-leaf aggregation after the CNN is not implemented;
    # we return the CNN features that would be fed to the forest.
    return features


if __name__ == "__main__":
    key = jax.random.PRNGKey(0)
    k_params, k_x = jax.random.split(key)
    params = init_params(k_params)
    x = jax.random.normal(k_x, (2, 784), dtype=jnp.float32)

    fwd = jax.jit(entire_network_forward)
    out = jax.block_until_ready(fwd(params, x))
    assert out.shape == (2, FEATURES4TREE)
    assert bool(jnp.all(jnp.isfinite(out)))
    print("KERNEL_OK")
</pallas_src>

<mosaic_0001>
module attributes {stable_mosaic.version = 11 : i64} {
  func.func @_matmul_bias_kernel(%arg0: i32, %arg1: memref<392x25xbf16, #tpu.memory_space<vmem>>, %arg2: memref<25x8xbf16, #tpu.memory_space<vmem>>, %arg3: memref<1x8xf32, #tpu.memory_space<vmem>>, %arg4: memref<392x8xbf16, #tpu.memory_space<vmem>>) attributes {dimension_semantics = [#tpu.dimension_semantics<parallel>], iteration_bounds = array<i64: 1>, scalar_prefetch = 0 : i64, scratch_operands = 0 : i64, tpu.core_type = #tpu.core_type<tc>, window_params = [{transform_indices = @transform_0, window_bounds = array<i64: 392, 25>}, {pipeline_mode = #tpu.pipeline_mode<synchronous>, transform_indices = @transform_1, window_bounds = array<i64: 25, 8>}, {pipeline_mode = #tpu.pipeline_mode<synchronous>, transform_indices = @transform_2, window_bounds = array<i64: 1, 8>}, {transform_indices = @transform_3, window_bounds = array<i64: 392, 8>}]} {
    %c0 = arith.constant 0 : index
    %c0_0 = arith.constant 0 : index
    %0 = vector.load %arg1[%c0, %c0_0] : memref<392x25xbf16, #tpu.memory_space<vmem>>, vector<392x25xbf16>
    %c0_1 = arith.constant 0 : index
    %c0_2 = arith.constant 0 : index
    %1 = vector.load %arg2[%c0_1, %c0_2] : memref<25x8xbf16, #tpu.memory_space<vmem>>, vector<25x8xbf16>
    %cst = arith.constant dense<0.000000e+00> : vector<392x8xf32>
    %2 = tpu.matmul %0, %1, %cst {dimension_numbers = #tpu.dot_dimension_numbers<[1], [0], [0], [1], [0, 0, 1, 1], [], []>} : vector<392x25xbf16>, vector<25x8xbf16>, vector<392x8xf32> -> vector<392x8xf32>
    %c0_3 = arith.constant 0 : index
    %c0_4 = arith.constant 0 : index
    %3 = vector.load %arg3[%c0_3, %c0_4] : memref<1x8xf32, #tpu.memory_space<vmem>>, vector<1x8xf32>
    %4 = vector.broadcast %3 : vector<1x8xf32> to vector<392x8xf32>
    %5 = arith.addf %2, %4 : vector<392x8xf32>
    %cst_5 = arith.constant 0.000000e+00 : f32
    %6 = vector.broadcast %cst_5 : f32 to vector<392x8xf32>
    %7 = arith.maximumf %5, %6 : vector<392x8xf32>
    %8 = arith.truncf %7 : vector<392x8xf32> to vector<392x8xbf16>
    %c0_6 = arith.constant 0 : index
    %c0_7 = arith.constant 0 : index
    %9 = vector.load %arg4[%c0_6, %c0_7] : memref<392x8xbf16, #tpu.memory_space<vmem>>, vector<392x8xbf16>
    tpu.vector_store %arg4[%c0_6, %c0_7], %8 {strides = array<i32>} : memref<392x8xbf16, #tpu.memory_space<vmem>>, vector<392x8xbf16>,
    return
  }
  func.func @transform_0(%arg0: i32) -> (i32, i32) {
    %c0_i32 = arith.constant 0 : i32
    %c0_i32_0 = arith.constant 0 : i32
    return %arg0, %c0_i32 : i32, i32
  }
  func.func @transform_1(%arg0: i32) -> (i32, i32) {
    %c0_i32 = arith.constant 0 : i32
    %c0_i32_0 = arith.constant 0 : i32
    %c0_i32_1 = arith.constant 0 : i32
    return %c0_i32, %c0_i32_0 : i32, i32
  }
  func.func @transform_2(%arg0: i32) -> (i32, i32) {
    %c0_i32 = arith.constant 0 : i32
    %c0_i32_0 = arith.constant 0 : i32
    %c0_i32_1 = arith.constant 0 : i32
    return %c0_i32, %c0_i32_0 : i32, i32
  }
  func.func @transform_3(%arg0: i32) -> (i32, i32) {
    %c0_i32 = arith.constant 0 : i32
    %c0_i32_0 = arith.constant 0 : i32
    return %arg0, %c0_i32 : i32, i32
  }
}

module attributes {stable_mosaic.version = 11 : i64} {
  func.func @_matmul_bias_kernel(%arg0: i32, %arg1: memref<98x72xbf16, #tpu.memory_space<vmem>>, %arg2: memref<72x16xbf16, #tpu.memory_space<vmem>>, %arg3: memref<1x16xf32, #tpu.memory_space<vmem>>, %arg4: memref<98x16xbf16, #tpu.memory_space<vmem>>) attributes {dimension_semantics = [#tpu.dimension_semantics<parallel>], iteration_bounds = array<i64: 1>, scalar_prefetch = 0 : i64, scratch_operands = 0 : i64, tpu.core_type = #tpu.core_type<tc>, window_params = [{transform_indices = @transform_0, window_bounds = array<i64: 98, 72>}, {pipeline_mode = #tpu.pipeline_mode<synchronous>, transform_indices = @transform_1, window_bounds = array<i64: 72, 16>}, {pipeline_mode = #tpu.pipeline_mode<synchronous>, transform_indices = @transform_2, window_bounds = array<i64: 1, 16>}, {transform_indices = @transform_3, window_bounds = array<i64: 98, 16>}]} {
    %c0 = arith.constant 0 : index
    %c0_0 = arith.constant 0 : index
    %0 = vector.load %arg1[%c0, %c0_0] : memref<98x72xbf16, #tpu.memory_space<vmem>>, vector<98x72xbf16>
    %c0_1 = arith.constant 0 : index
    %c0_2 = arith.constant 0 : index
    %1 = vector.load %arg2[%c0_1, %c0_2] : memref<72x16xbf16, #tpu.memory_space<vmem>>, vector<72x16xbf16>
    %cst = arith.constant dense<0.000000e+00> : vector<98x16xf32>
    %2 = tpu.matmul %0, %1, %cst {dimension_numbers = #tpu.dot_dimension_numbers<[1], [0], [0], [1], [0, 0, 1, 1], [], []>} : vector<98x72xbf16>, vector<72x16xbf16>, vector<98x16xf32> -> vector<98x16xf32>
    %c0_3 = arith.constant 0 : index
    %c0_4 = arith.constant 0 : index
    %3 = vector.load %arg3[%c0_3, %c0_4] : memref<1x16xf32, #tpu.memory_space<vmem>>, vector<1x16xf32>
    %4 = vector.broadcast %3 : vector<1x16xf32> to vector<98x16xf32>
    %5 = arith.addf %2, %4 : vector<98x16xf32>
    %cst_5 = arith.constant 0.000000e+00 : f32
    %6 = vector.broadcast %cst_5 : f32 to vector<98x16xf32>
    %7 = arith.maximumf %5, %6 : vector<98x16xf32>
    %8 = arith.truncf %7 : vector<98x16xf32> to vector<98x16xbf16>
    %c0_6 = arith.constant 0 : index
    %c0_7 = arith.constant 0 : index
    %9 = vector.load %arg4[%c0_6, %c0_7] : memref<98x16xbf16, #tpu.memory_space<vmem>>, vector<98x16xbf16>
    tpu.vector_store %arg4[%c0_6, %c0_7], %8 {strides = array<i32>} : memref<98x16xbf16, #tpu.memory_space<vmem>>, vector<98x16xbf16>,
    return
  }
  func.func @transform_0(%arg0: i32) -> (i32, i32) {
    %c0_i32 = arith.constant 0 : i32
    %c0_i32_0 = arith.constant 0 : i32
    return %arg0, %c0_i32 : i32, i32
  }
  func.func @transform_1(%arg0: i32) -> (i32, i32) {
    %c0_i32 = arith.constant 0 : i32
    %c0_i32_0 = arith.constant 0 : i32
    %c0_i32_1 = arith.constant 0 : i32
    return %c0_i32, %c0_i32_0 : i32, i32
  }
  func.func @transform_2(%arg0: i32) -> (i32, i32) {
    %c0_i32 = arith.constant 0 : i32
    %c0_i32_0 = arith.constant 0 : i32
    %c0_i32_1 = arith.constant 0 : i32
    return %c0_i32, %c0_i32_0 : i32, i32
  }
  func.func @transform_3(%arg0: i32) -> (i32, i32) {
    %c0_i32 = arith.constant 0 : i32
    %c0_i32_0 = arith.constant 0 : i32
    return %arg0, %c0_i32 : i32, i32
  }
}

module attributes {stable_mosaic.version = 11 : i64} {
  func.func @_matmul_bias_kernel(%arg0: i32, %arg1: memref<32x144xbf16, #tpu.memory_space<vmem>>, %arg2: memref<144x32xbf16, #tpu.memory_space<vmem>>, %arg3: memref<1x32xf32, #tpu.memory_space<vmem>>, %arg4: memref<32x32xbf16, #tpu.memory_space<vmem>>) attributes {dimension_semantics = [#tpu.dimension_semantics<parallel>], iteration_bounds = array<i64: 1>, scalar_prefetch = 0 : i64, scratch_operands = 0 : i64, tpu.core_type = #tpu.core_type<tc>, window_params = [{transform_indices = @transform_0, window_bounds = array<i64: 32, 144>}, {pipeline_mode = #tpu.pipeline_mode<synchronous>, transform_indices = @transform_1, window_bounds = array<i64: 144, 32>}, {pipeline_mode = #tpu.pipeline_mode<synchronous>, transform_indices = @transform_2, window_bounds = array<i64: 1, 32>}, {transform_indices = @transform_3, window_bounds = array<i64: 32, 32>}]} {
    %c0 = arith.constant 0 : index
    %c0_0 = arith.constant 0 : index
    %0 = vector.load %arg1[%c0, %c0_0] : memref<32x144xbf16, #tpu.memory_space<vmem>>, vector<32x144xbf16>
    %c0_1 = arith.constant 0 : index
    %c0_2 = arith.constant 0 : index
    %1 = vector.load %arg2[%c0_1, %c0_2] : memref<144x32xbf16, #tpu.memory_space<vmem>>, vector<144x32xbf16>
    %cst = arith.constant dense<0.000000e+00> : vector<32x32xf32>
    %2 = tpu.matmul %0, %1, %cst {dimension_numbers = #tpu.dot_dimension_numbers<[1], [0], [0], [1], [0, 0, 1, 1], [], []>} : vector<32x144xbf16>, vector<144x32xbf16>, vector<32x32xf32> -> vector<32x32xf32>
    %c0_3 = arith.constant 0 : index
    %c0_4 = arith.constant 0 : index
    %3 = vector.load %arg3[%c0_3, %c0_4] : memref<1x32xf32, #tpu.memory_space<vmem>>, vector<1x32xf32>
    %4 = vector.broadcast %3 : vector<1x32xf32> to vector<32x32xf32>
    %5 = arith.addf %2, %4 : vector<32x32xf32>
    %cst_5 = arith.constant 0.000000e+00 : f32
    %6 = vector.broadcast %cst_5 : f32 to vector<32x32xf32>
    %7 = arith.maximumf %5, %6 : vector<32x32xf32>
    %8 = arith.truncf %7 : vector<32x32xf32> to vector<32x32xbf16>
    %c0_6 = arith.constant 0 : index
    %c0_7 = arith.constant 0 : index
    %9 = vector.load %arg4[%c0_6, %c0_7] : memref<32x32xbf16, #tpu.memory_space<vmem>>, vector<32x32xbf16>
    tpu.vector_store %arg4[%c0_6, %c0_7], %8 {strides = array<i32>} : memref<32x32xbf16, #tpu.memory_space<vmem>>, vector<32x32xbf16>,
    return
  }
  func.func @transform_0(%arg0: i32) -> (i32, i32) {
    %c0_i32 = arith.constant 0 : i32
    %c0_i32_0 = arith.constant 0 : i32
    return %arg0, %c0_i32 : i32, i32
  }
  func.func @transform_1(%arg0: i32) -> (i32, i32) {
    %c0_i32 = arith.constant 0 : i32
    %c0_i32_0 = arith.constant 0 : i32
    %c0_i32_1 = arith.constant 0 : i32
    return %c0_i32, %c0_i32_0 : i32, i32
  }
  func.func @transform_2(%arg0: i32) -> (i32, i32) {
    %c0_i32 = arith.constant 0 : i32
    %c0_i32_0 = arith.constant 0 : i32
    %c0_i32_1 = arith.constant 0 : i32
    return %c0_i32, %c0_i32_0 : i32, i32
  }
  func.func @transform_3(%arg0: i32) -> (i32, i32) {
    %c0_i32 = arith.constant 0 : i32
    %c0_i32_0 = arith.constant 0 : i32
    return %arg0, %c0_i32 : i32, i32
  }
}

module attributes {stable_mosaic.version = 11 : i64} {
  func.func @_conv_pool_linear_kernel(%arg0: i32, %arg1: memref<4x2x288xbf16, #tpu.memory_space<vmem>>, %arg2: memref<288x32xbf16, #tpu.memory_space<vmem>>, %arg3: memref<1x32xf32, #tpu.memory_space<vmem>>, %arg4: memref<32x16xbf16, #tpu.memory_space<vmem>>, %arg5: memref<1x16xf32, #tpu.memory_space<vmem>>, %arg6: memref<2x16xf32, #tpu.memory_space<vmem>>) attributes {dimension_semantics = [#tpu.dimension_semantics<parallel>], iteration_bounds = array<i64: 1>, scalar_prefetch = 0 : i64, scratch_operands = 0 : i64, tpu.core_type = #tpu.core_type<tc>, window_params = [{transform_indices = @transform_0, window_bounds = array<i64: 4, 2, 288>}, {pipeline_mode = #tpu.pipeline_mode<synchronous>, transform_indices = @transform_1, window_bounds = array<i64: 288, 32>}, {pipeline_mode = #tpu.pipeline_mode<synchronous>, transform_indices = @transform_2, window_bounds = array<i64: 1, 32>}, {pipeline_mode = #tpu.pipeline_mode<synchronous>, transform_indices = @transform_3, window_bounds = array<i64: 32, 16>}, {pipeline_mode = #tpu.pipeline_mode<synchronous>, transform_indices = @transform_4, window_bounds = array<i64: 1, 16>}, {transform_indices = @transform_5, window_bounds = array<i64: 2, 16>}]} {
    %c0 = arith.constant 0 : index
    %c0_0 = arith.constant 0 : index
    %c0_1 = arith.constant 0 : index
    %0 = vector.load %arg1[%c0, %c0_0, %c0_1] : memref<4x2x288xbf16, #tpu.memory_space<vmem>>, vector<1x2x288xbf16>
    %1 = vector.shape_cast %0 : vector<1x2x288xbf16> to vector<2x288xbf16>
    %c0_2 = arith.constant 0 : index
    %c0_3 = arith.constant 0 : index
    %2 = vector.load %arg2[%c0_2, %c0_3] : memref<288x32xbf16, #tpu.memory_space<vmem>>, vector<288x32xbf16>
    %cst = arith.constant dense<0.000000e+00> : vector<2x32xf32>
    %3 = tpu.matmul %1, %2, %cst {dimension_numbers = #tpu.dot_dimension_numbers<[1], [0], [0], [1], [0, 0, 1, 1], [], []>} : vector<2x288xbf16>, vector<288x32xbf16>, vector<2x32xf32> -> vector<2x32xf32>
    %c0_4 = arith.constant 0 : index
    %c0_5 = arith.constant 0 : index
    %4 = vector.load %arg3[%c0_4, %c0_5] : memref<1x32xf32, #tpu.memory_space<vmem>>, vector<1x32xf32>
    %5 = vector.broadcast %4 : vector<1x32xf32> to vector<2x32xf32>
    %6 = arith.addf %3, %5 : vector<2x32xf32>
    %cst_6 = arith.constant 0.000000e+00 : f32
    %7 = vector.broadcast %cst_6 : f32 to vector<2x32xf32>
    %8 = arith.maximumf %6, %7 : vector<2x32xf32>
    %c1 = arith.constant 1 : index
    %c0_7 = arith.constant 0 : index
    %c0_8 = arith.constant 0 : index
    %9 = vector.load %arg1[%c1, %c0_7, %c0_8] : memref<4x2x288xbf16, #tpu.memory_space<vmem>>, vector<1x2x288xbf16>
    %10 = vector.shape_cast %9 : vector<1x2x288xbf16> to vector<2x288xbf16>
    %c0_9 = arith.constant 0 : index
    %c0_10 = arith.constant 0 : index
    %11 = vector.load %arg2[%c0_9, %c0_10] : memref<288x32xbf16, #tpu.memory_space<vmem>>, vector<288x32xbf16>
    %cst_11 = arith.constant dense<0.000000e+00> : vector<2x32xf32>
    %12 = tpu.matmul %10, %11, %cst_11 {dimension_numbers = #tpu.dot_dimension_numbers<[1], [0], [0], [1], [0, 0, 1, 1], [], []>} : vector<2x288xbf16>, vector<288x32xbf16>, vector<2x32xf32> -> vector<2x32xf32>
    %c0_12 = arith.constant 0 : index
    %c0_13 = arith.constant 0 : index
    %13 = vector.load %arg3[%c0_12, %c0_13] : memref<1x32xf32, #tpu.memory_space<vmem>>, vector<1x32xf32>
    %14 = vector.broadcast %13 : vector<1x32xf32> to vector<2x32xf32>
    %15 = arith.addf %12, %14 : vector<2x32xf32>
    %cst_14 = arith.constant 0.000000e+00 : f32
    %16 = vector.broadcast %cst_14 : f32 to vector<2x32xf32>
    %17 = arith.maximumf %15, %16 : vector<2x32xf32>
    %18 = arith.addf %8, %17 : vector<2x32xf32>
    %c2 = arith.constant 2 : index
    %c0_15 = arith.constant 0 : index
    %c0_16 = arith.constant 0 : index
    %19 = vector.load %arg1[%c2, %c0_15, %c0_16] : memref<4x2x288xbf16, #tpu.memory_space<vmem>>, vector<1x2x288xbf16>
    %20 = vector.shape_cast %19 : vector<1x2x288xbf16> to vector<2x288xbf16>
    %c0_17 = arith.constant 0 : index
    %c0_18 = arith.constant 0 : index
    %21 = vector.load %arg2[%c0_17, %c0_18] : memref<288x32xbf16, #tpu.memory_space<vmem>>, vector<288x32xbf16>
    %cst_19 = arith.constant dense<0.000000e+00> : vector<2x32xf32>
    %22 = tpu.matmul %20, %21, %cst_19 {dimension_numbers = #tpu.dot_dimension_numbers<[1], [0], [0], [1], [0, 0, 1, 1], [], []>} : vector<2x288xbf16>, vector<288x32xbf16>, vector<2x32xf32> -> vector<2x32xf32>
    %c0_20 = arith.constant 0 : index
    %c0_21 = arith.constant 0 : index
    %23 = vector.load %arg3[%c0_20, %c0_21] : memref<1x32xf32, #tpu.memory_space<vmem>>, vector<1x32xf32>
    %24 = vector.broadcast %23 : vector<1x32xf32> to vector<2x32xf32>
    %25 = arith.addf %22, %24 : vector<2x32xf32>
    %cst_22 = arith.constant 0.000000e+00 : f32
    %26 = vector.broadcast %cst_22 : f32 to vector<2x32xf32>
    %27 = arith.maximumf %25, %26 : vector<2x32xf32>
    %28 = arith.addf %18, %27 : vector<2x32xf32>
    %c3 = arith.constant 3 : index
    %c0_23 = arith.constant 0 : index
    %c0_24 = arith.constant 0 : index
    %29 = vector.load %arg1[%c3, %c0_23, %c0_24] : memref<4x2x288xbf16, #tpu.memory_space<vmem>>, vector<1x2x288xbf16>
    %30 = vector.shape_cast %29 : vector<1x2x288xbf16> to vector<2x288xbf16>
    %c0_25 = arith.constant 0 : index
    %c0_26 = arith.constant 0 : index
    %31 = vector.load %arg2[%c0_25, %c0_26] : memref<288x32xbf16, #tpu.memory_space<vmem>>, vector<288x32xbf16>
    %cst_27 = arith.constant dense<0.000000e+00> : vector<2x32xf32>
    %32 = tpu.matmul %30, %31, %cst_27 {dimension_numbers = #tpu.dot_dimension_numbers<[1], [0], [0], [1], [0, 0, 1, 1], [], []>} : vector<2x288xbf16>, vector<288x32xbf16>, vector<2x32xf32> -> vector<2x32xf32>
    %c0_28 = arith.constant 0 : index
    %c0_29 = arith.constant 0 : index
    %33 = vector.load %arg3[%c0_28, %c0_29] : memref<1x32xf32, #tpu.memory_space<vmem>>, vector<1x32xf32>
    %34 = vector.broadcast %33 : vector<1x32xf32> to vector<2x32xf32>
    %35 = arith.addf %32, %34 : vector<2x32xf32>
    %cst_30 = arith.constant 0.000000e+00 : f32
    %36 = vector.broadcast %cst_30 : f32 to vector<2x32xf32>
    %37 = arith.maximumf %35, %36 : vector<2x32xf32>
    %38 = arith.addf %28, %37 : vector<2x32xf32>
    %cst_31 = arith.constant 2.500000e-01 : f32
    %39 = vector.broadcast %cst_31 : f32 to vector<2x32xf32>
    %40 = arith.mulf %38, %39 : vector<2x32xf32>
    %41 = arith.truncf %40 : vector<2x32xf32> to vector<2x32xbf16>
    %c0_32 = arith.constant 0 : index
    %c0_33 = arith.constant 0 : index
    %42 = vector.load %arg4[%c0_32, %c0_33] : memref<32x16xbf16, #tpu.memory_space<vmem>>, vector<32x16xbf16>
    %cst_34 = arith.constant dense<0.000000e+00> : vector<2x16xf32>
    %43 = tpu.matmul %41, %42, %cst_34 {dimension_numbers = #tpu.dot_dimension_numbers<[1], [0], [0], [1], [0, 0, 1, 1], [], []>} : vector<2x32xbf16>, vector<32x16xbf16>, vector<2x16xf32> -> vector<2x16xf32>
    %c0_35 = arith.constant 0 : index
    %c0_36 = arith.constant 0 : index
    %44 = vector.load %arg5[%c0_35, %c0_36] : memref<1x16xf32, #tpu.memory_space<vmem>>, vector<1x16xf32>
    %45 = vector.broadcast %44 : vector<1x16xf32> to vector<2x16xf32>
    %46 = arith.addf %43, %45 : vector<2x16xf32>
    %c0_37 = arith.constant 0 : index
    %c0_38 = arith.constant 0 : index
    %47 = vector.load %arg6[%c0_37, %c0_38] : memref<2x16xf32, #tpu.memory_space<vmem>>, vector<2x16xf32>
    tpu.vector_store %arg6[%c0_37, %c0_38], %46 {strides = array<i32>} : memref<2x16xf32, #tpu.memory_space<vmem>>, vector<2x16xf32>,
    return
  }
  func.func @transform_0(%arg0: i32) -> (i32, i32, i32) {
    %c0_i32 = arith.constant 0 : i32
    %c0_i32_0 = arith.constant 0 : i32
    %c0_i32_1 = arith.constant 0 : i32
    return %c0_i32, %arg0, %c0_i32_0 : i32, i32, i32
  }
  func.func @transform_1(%arg0: i32) -> (i32, i32) {
    %c0_i32 = arith.constant 0 : i32
    %c0_i32_0 = arith.constant 0 : i32
    %c0_i32_1 = arith.constant 0 : i32
    return %c0_i32, %c0_i32_0 : i32, i32
  }
  func.func @transform_2(%arg0: i32) -> (i32, i32) {
    %c0_i32 = arith.constant 0 : i32
    %c0_i32_0 = arith.constant 0 : i32
    %c0_i32_1 = arith.constant 0 : i32
    return %c0_i32, %c0_i32_0 : i32, i32
  }
  func.func @transform_3(%arg0: i32) -> (i32, i32) {
    %c0_i32 = arith.constant 0 : i32
    %c0_i32_0 = arith.constant 0 : i32
    %c0_i32_1 = arith.constant 0 : i32
    return %c0_i32, %c0_i32_0 : i32, i32
  }
  func.func @transform_4(%arg0: i32) -> (i32, i32) {
    %c0_i32 = arith.constant 0 : i32
    %c0_i32_0 = arith.constant 0 : i32
    %c0_i32_1 = arith.constant 0 : i32
    return %c0_i32, %c0_i32_0 : i32, i32
  }
  func.func @transform_5(%arg0: i32) -> (i32, i32) {
    %c0_i32 = arith.constant 0 : i32
    %c0_i32_0 = arith.constant 0 : i32
    return %arg0, %c0_i32 : i32, i32
  }
}

</mosaic_0001>

<bundles_post_ra>
// kernel: entire_network_forward.4
= control target key start
LH: loop header
LB: loop body
LE: loop exit
PB: predicated region body
PF: predicated region fallthrough
CT: control target
= control target key end

     0   :  { %vm285_vm0 = vcmask 1043456   ;;  %vm286_vm1 = vcmask 1044480   ;;  %v1140_v0 = vmov 0.0   ;;  %v1141_v2 = vmov 65535   ;;  %s1573_s1 = inlined_call_operand.vmem [shape: bf16[25,8], index: 1, kind: input, shape index: {}]   ;;  %s1574_s0 = inlined_call_operand.vmem [shape: bf16[392,25], index: 0, kind: input, shape index: {}]   ;;  %s1575_s2 = inlined_call_operand.vmem [shape: f32[1,8], index: 2, kind: input, shape index: {}]   ;;  %s1576_s3 = inlined_call_operand.vmem [shape: bf16[392,8], index: 3, kind: output, shape index: {}]  }
   0x1   :  { %1002 = vmatprep.subr.bf16.mxu0 %v1140_v0  ;;  %v1113_v1 = vld [vmem:[%s1573_s1 + $0x8] sm:$0x1f]   ;;  %1106 = vmatprep.subr.bf16.mxu1 %v1140_v0  ;;  %v287_v3 = vsel %vm285_vm0, 4294967295, %v1141_v2  ;;  %vm1142_vm2 = vmmov 0   ;;  %v1114_v6 = vld [vmem:[%s1573_s1] sm:$0xff]   ;;  %vm209_vm3 = vcmask 203776  }
   0x2   :  { %v288_v4 = vsel %vm286_vm1, %v287_v3, 0  ;;  %1006 = vmatprep.mubr.msk.bf16.mxu0 %vm1142_vm2, %v1140_v0  ;;  %1058 = vmatprep.mubr.msk.bf16.mxu1 %vm1142_vm2, %v1140_v0  ;;  %v1115_v7 = vld [vmem:[%s1574_s0] sm:$0xff]   ;;  %v1116_v8 = vld [vmem:[%s1574_s0 + $0x68] sm:$0xff]   ;;  %v1118_v10 = vld [vmem:[%s1574_s0 + $0x70] sm:$0xff]   ;;  %vm770_vm4 = vcmask 60416  }
   0x3   :  { %v290_v5 = vand.u32 %v1113_v1, %v288_v4  ;;  %v1117_v9 = vld [vmem:[%s1574_s0 + $0x8] sm:$0xff]   ;;  %v1119_v11 = vld [vmem:[%s1574_s0 + $0x10] sm:$0xff]   ;;  %v1120_v12 = vld [vmem:[%s1574_s0 + $0x78] sm:$0xff]  }
   0x4   :  { %v1121_v13 = vld [vmem:[%s1574_s0 + $0x18] sm:$0xff]   ;;  %v1122_v14 = vld [vmem:[%s1574_s0 + $0x80] sm:$0xff]   ;;  %v1124_v16 = vld [vmem:[%s1574_s0 + $0x88] sm:$0xff]  }
   0x5   :  { %1003 = vmatpush3.bf16.msra.mxu0 %v290_v5  ;;  %1108 = vmatpush3.bf16.msra.mxu1 %v290_v5  ;;  %v1123_v15 = vld [vmem:[%s1574_s0 + $0x20] sm:$0xff]   ;;  %v1125_v17 = vld [vmem:[%s1574_s0 + $0x28] sm:$0xff]   ;;  %v1126_v18 = vld [vmem:[%s1574_s0 + $0x90] sm:$0xff]  }
   0x6   :  { %1004 = vmatprep.subr.bf16.mxu0 %v1140_v0  ;;  %1107 = vmatprep.subr.bf16.mxu1 %v1140_v0  ;;  %v1127_v19 = vld [vmem:[%s1574_s0 + $0x30] sm:$0xff]   ;;  %v1128_v20 = vld [vmem:[%s1574_s0 + $0x98] sm:$0xff]   ;;  %v1130_v22 = vld [vmem:[%s1574_s0 + $0xa0] sm:$0xff]  }
   0x7   :  { %v1129_v21 = vld [vmem:[%s1574_s0 + $0x38] sm:$0xff]   ;;  %v1131_v23 = vld [vmem:[%s1574_s0 + $0x40] sm:$0xff]   ;;  %v1132_v24 = vld [vmem:[%s1574_s0 + $0xa8] sm:$0xff]  }
   0x8   :  { %v1133_v25 = vld [vmem:[%s1574_s0 + $0x48] sm:$0xff]   ;;  %v1134_v26 = vld [vmem:[%s1574_s0 + $0xb0] sm:$0xff]   ;;  %v1136_v28 = vld [vmem:[%s1574_s0 + $0xb8] sm:$0xff]  }
   0x9   :  { %1005 = vmatpush3.bf16.msra.mxu0 %v1114_v6  ;;  %1109 = vmatpush3.bf16.msra.mxu1 %v1114_v6  ;;  %v1135_v27 = vld [vmem:[%s1574_s0 + $0x50] sm:$0xff]   ;;  %v1137_v29 = vld [vmem:[%s1574_s0 + $0x58] sm:$0xff]   ;;  %v1138_v30 = vld [vmem:[%s1574_s0 + $0xc0] ss:$0 sps:$4 sm:$0xff]  }
   0xa   :  { %v1139_v31 = vld [vmem:[%s1574_s0 + $0x60] sm:$0xff]  }
   0xb   :  { %v1326_v32 = vld [vmem:[%s1575_s2] ss:$0 sm:$0xff] }
   0xc   :  { %1007 = vmatmul.mubr.msk.bf16.vlgmr.msra.gmra.mxu0 %vm209_vm3, %v1115_v7  ;;  %1059 = vmatmul.mubr.msk.bf16.vlgmr.msra.gmra.mxu1 %vm209_vm3, %v1116_v8 }
   0xd   :  { %1010 = vmatprep.mubr.msk.bf16.mxu0 %vm1142_vm2, %v1140_v0  ;;  %1062 = vmatprep.mubr.msk.bf16.mxu1 %vm1142_vm2, %v1140_v0 }
  0x14   :  { %1011 = vmatmul.mubr.msk.bf16.gmra.mxu0 %vm209_vm3, %v1117_v9  ;;  %1063 = vmatmul.mubr.msk.bf16.gmra.mxu1 %vm209_vm3, %v1118_v10 }
  0x15   :  { %1014 = vmatprep.mubr.msk.bf16.mxu0 %vm1142_vm2, %v1140_v0  ;;  %1066 = vmatprep.mubr.msk.bf16.mxu1 %vm1142_vm2, %v1140_v0 }
  0x1c   :  { %1015 = vmatmul.mubr.msk.bf16.gmra.mxu0 %vm209_vm3, %v1119_v11  ;;  %1067 = vmatmul.mubr.msk.bf16.gmra.mxu1 %vm209_vm3, %v1120_v12 }
  0x1d   :  { %1018 = vmatprep.mubr.msk.bf16.mxu0 %vm1142_vm2, %v1140_v0  ;;  %1070 = vmatprep.mubr.msk.bf16.mxu1 %vm1142_vm2, %v1140_v0 }
  0x24   :  { %1019 = vmatmul.mubr.msk.bf16.gmra.mxu0 %vm209_vm3, %v1121_v13  ;;  %1071 = vmatmul.mubr.msk.bf16.gmra.mxu1 %vm209_vm3, %v1122_v14 }
  0x25   :  { %1022 = vmatprep.mubr.msk.bf16.mxu0 %vm1142_vm2, %v1140_v0  ;;  %1074 = vmatprep.mubr.msk.bf16.mxu1 %vm1142_vm2, %v1140_v0 }
  0x2c   :  { %1023 = vmatmul.mubr.msk.bf16.gmra.mxu0 %vm209_vm3, %v1123_v15  ;;  %1075 = vmatmul.mubr.msk.bf16.gmra.mxu1 %vm209_vm3, %v1124_v16 }
  0x2d   :  { %1026 = vmatprep.mubr.msk.bf16.mxu0 %vm1142_vm2, %v1140_v0  ;;  %1078 = vmatprep.mubr.msk.bf16.mxu1 %vm1142_vm2, %v1140_v0 }
  0x34   :  { %1027 = vmatmul.mubr.msk.bf16.gmra.mxu0 %vm209_vm3, %v1125_v17  ;;  %1079 = vmatmul.mubr.msk.bf16.gmra.mxu1 %vm209_vm3, %v1126_v18 }
  0x35   :  { %1030 = vmatprep.mubr.msk.bf16.mxu0 %vm1142_vm2, %v1140_v0  ;;  %1082 = vmatprep.mubr.msk.bf16.mxu1 %vm1142_vm2, %v1140_v0 }
  0x3c   :  { %1031 = vmatmul.mubr.msk.bf16.gmra.mxu0 %vm209_vm3, %v1127_v19  ;;  %1083 = vmatmul.mubr.msk.bf16.gmra.mxu1 %vm209_vm3, %v1128_v20 }
  0x3d   :  { %1034 = vmatprep.mubr.msk.bf16.mxu0 %vm1142_vm2, %v1140_v0  ;;  %1086 = vmatprep.mubr.msk.bf16.mxu1 %vm1142_vm2, %v1140_v0 }
  0x44   :  { %1035 = vmatmul.mubr.msk.bf16.gmra.mxu0 %vm209_vm3, %v1129_v21  ;;  %1087 = vmatmul.mubr.msk.bf16.gmra.mxu1 %vm209_vm3, %v1130_v22 }
  0x45   :  { %1038 = vmatprep.mubr.msk.bf16.mxu0 %vm1142_vm2, %v1140_v0  ;;  %1090 = vmatprep.mubr.msk.bf16.mxu1 %vm1142_vm2, %v1140_v0 }
  0x4c   :  { %1039 = vmatmul.mubr.msk.bf16.gmra.mxu0 %vm209_vm3, %v1131_v23  ;;  %1091 = vmatmul.mubr.msk.bf16.gmra.mxu1 %vm209_vm3, %v1132_v24 }
  0x4d   :  { %1042 = vmatprep.mubr.msk.bf16.mxu0 %vm1142_vm2, %v1140_v0  ;;  %1094 = vmatprep.mubr.msk.bf16.mxu1 %vm1142_vm2, %v1140_v0 }
  0x54   :  { %1043 = vmatmul.mubr.msk.bf16.gmra.mxu0 %vm209_vm3, %v1133_v25  ;;  %1095 = vmatmul.mubr.msk.bf16.gmra.mxu1 %vm209_vm3, %v1134_v26 }
  0x55   :  { %1046 = vmatprep.mubr.msk.bf16.mxu0 %vm1142_vm2, %v1140_v0  ;;  %1098 = vmatprep.mubr.msk.bf16.mxu1 %vm1142_vm2, %v1140_v0 }
  0x5c   :  { %1047 = vmatmul.mubr.msk.bf16.gmra.mxu0 %vm209_vm3, %v1135_v27  ;;  %1099 = vmatmul.mubr.msk.bf16.gmra.mxu1 %vm209_vm3, %v1136_v28 }
  0x5d   :  { %1050 = vmatprep.mubr.msk.bf16.mxu0 %vm1142_vm2, %v1140_v0  ;;  %1102 = vmatprep.mubr.msk.bf16.mxu1 %vm1142_vm2, %v1140_v0 }
  0x64   :  { %1051 = vmatmul.mubr.msk.bf16.gmra.mxu0 %vm209_vm3, %v1137_v29  ;;  %1103 = vmatmul.mubr.msk.bf16.gmra.mxu1 %vm209_vm3, %v1138_v30 }
  0x65   :  { %1054 = vmatprep.mubr.msk.bf16.mxu0 %vm1142_vm2, %v1140_v0 }
  0x6c   :  { %1055 = vmatmul.mubr.msk.bf16.gmra.mxu0 %vm209_vm3, %v1139_v31 }
  0xcc   :  { %v326_v33 = vpop.f32.mrf.mxu0  ;;  %v430_v34 = vpop.f32.mrf.mxu1 }
  0xcd   :  { %v327_v35 = vadd.f32 %v1326_v32, %v326_v33  ;;  %v431_v36 = vadd.f32 %v1326_v32, %v430_v34 }
  0xce   :  { %v1008_v37 = vpop.f32.mrf.mxu0  ;;  %v1060_v38 = vpop.f32.mrf.mxu1 }
  0xcf   :  { %v524_v39 = vmax.f32 %v327_v35, 0.0  ;;  %v550_v40 = vmax.f32 %v431_v36, 0.0 }
  0xd0   :  { %v329_v41 = vpop.f32.mrf.mxu0  ;;  %v433_v42 = vpop.f32.mrf.mxu1 }
  0xd1   :  { %v926_v43 = vpack.c.bf16 %v524_v39, %v524_v39  ;;  %v330_v44 = vadd.f32 %v1326_v32, %v329_v41  ;;  %v952_v45 = vpack.c.bf16 %v550_v40, %v550_v40  ;;  %v434_v46 = vadd.f32 %v1326_v32, %v433_v42 }
  0xd2   :  { %v1009_v47 = vpop.f32.mrf.mxu0  ;;  %v1061_v48 = vpop.f32.mrf.mxu1 }
  0xd3   :  { %771 = vst.msk [vmem:[%s1576_s3] sm:$0xf] %vm770_vm4, %v926_v43  ;;  %v525_v49 = vmax.f32 %v330_v44, 0.0  ;;  %797 = vst.msk [vmem:[%s1576_s3 + $0x68] sm:$0xf] %vm770_vm4, %v952_v45  ;;  %v551_v50 = vmax.f32 %v434_v46, 0.0 }
  0xd4   :  { %v334_v51 = vpop.f32.mrf.mxu0  ;;  %v438_v52 = vpop.f32.mrf.mxu1 }
  0xd5   :  { %v927_v53 = vpack.c.bf16 %v525_v49, %v525_v49  ;;  %v335_v54 = vadd.f32 %v1326_v32, %v334_v51  ;;  %v953_v55 = vpack.c.bf16 %v551_v50, %v551_v50  ;;  %v439_v56 = vadd.f32 %v1326_v32, %v438_v52 }
  0xd6   :  { %v1012_v57 = vpop.f32.mrf.mxu0  ;;  %v1064_v58 = vpop.f32.mrf.mxu1 }
  0xd7   :  { %772 = vst.msk [vmem:[%s1576_s3 + $0x4] sm:$0xf] %vm770_vm4, %v927_v53  ;;  %v526_v59 = vmax.f32 %v335_v54, 0.0  ;;  %798 = vst.msk [vmem:[%s1576_s3 + $0x6c] sm:$0xf] %vm770_vm4, %v953_v55  ;;  %v552_v60 = vmax.f32 %v439_v56, 0.0 }
  0xd8   :  { %v337_v61 = vpop.f32.mrf.mxu0  ;;  %v441_v62 = vpop.f32.mrf.mxu1 }
  0xd9   :  { %v928_v63 = vpack.c.bf16 %v526_v59, %v526_v59  ;;  %v338_v0 = vadd.f32 %v1326_v32, %v337_v61  ;;  %v954_v1 = vpack.c.bf16 %v552_v60, %v552_v60  ;;  %v442_v2 = vadd.f32 %v1326_v32, %v441_v62 }
  0xda   :  { %v1013_v3 = vpop.f32.mrf.mxu0  ;;  %v1065_v4 = vpop.f32.mrf.mxu1 }
  0xdb   :  { %773 = vst.msk [vmem:[%s1576_s3 + $0x8] sm:$0xf] %vm770_vm4, %v928_v63  ;;  %v527_v5 = vmax.f32 %v338_v0, 0.0  ;;  %799 = vst.msk [vmem:[%s1576_s3 + $0x70] sm:$0xf] %vm770_vm4, %v954_v1  ;;  %v553_v6 = vmax.f32 %v442_v2, 0.0 }
  0xdc   :  { %v342_v7 = vpop.f32.mrf.mxu0  ;;  %v446_v8 = vpop.f32.mrf.mxu1 }
  0xdd   :  { %v929_v9 = vpack.c.bf16 %v527_v5, %v527_v5  ;;  %v343_v10 = vadd.f32 %v1326_v32, %v342_v7  ;;  %v955_v11 = vpack.c.bf16 %v553_v6, %v553_v6  ;;  %v447_v12 = vadd.f32 %v1326_v32, %v446_v8 }
  0xde   :  { %v1016_v13 = vpop.f32.mrf.mxu0  ;;  %v1068_v14 = vpop.f32.mrf.mxu1 }
  0xdf   :  { %774 = vst.msk [vmem:[%s1576_s3 + $0xc] sm:$0xf] %vm770_vm4, %v929_v9  ;;  %v528_v15 = vmax.f32 %v343_v10, 0.0  ;;  %800 = vst.msk [vmem:[%s1576_s3 + $0x74] sm:$0xf] %vm770_vm4, %v955_v11  ;;  %v554_v16 = vmax.f32 %v447_v12, 0.0 }
  0xe0   :  { %v345_v17 = vpop.f32.mrf.mxu0  ;;  %v449_v18 = vpop.f32.mrf.mxu1 }
  0xe1   :  { %v930_v19 = vpack.c.bf16 %v528_v15, %v528_v15  ;;  %v346_v20 = vadd.f32 %v1326_v32, %v345_v17  ;;  %v956_v21 = vpack.c.bf16 %v554_v16, %v554_v16  ;;  %v450_v22 = vadd.f32 %v1326_v32, %v449_v18 }
  0xe2   :  { %v1017_v23 = vpop.f32.mrf.mxu0  ;;  %v1069_v24 = vpop.f32.mrf.mxu1 }
  0xe3   :  { %775 = vst.msk [vmem:[%s1576_s3 + $0x10] sm:$0xf] %vm770_vm4, %v930_v19  ;;  %v529_v25 = vmax.f32 %v346_v20, 0.0  ;;  %801 = vst.msk [vmem:[%s1576_s3 + $0x78] sm:$0xf] %vm770_vm4, %v956_v21  ;;  %v555_v26 = vmax.f32 %v450_v22, 0.0 }
  0xe4   :  { %v350_v27 = vpop.f32.mrf.mxu0  ;;  %v454_v28 = vpop.f32.mrf.mxu1 }
  0xe5   :  { %v931_v29 = vpack.c.bf16 %v529_v25, %v529_v25  ;;  %v351_v30 = vadd.f32 %v1326_v32, %v350_v27  ;;  %v957_v31 = vpack.c.bf16 %v555_v26, %v555_v26  ;;  %v455_v33 = vadd.f32 %v1326_v32, %v454_v28 }
  0xe6   :  { %v1020_v34 = vpop.f32.mrf.mxu0  ;;  %v1072_v35 = vpop.f32.mrf.mxu1 }
  0xe7   :  { %776 = vst.msk [vmem:[%s1576_s3 + $0x14] sm:$0xf] %vm770_vm4, %v931_v29  ;;  %v530_v36 = vmax.f32 %v351_v30, 0.0  ;;  %802 = vst.msk [vmem:[%s1576_s3 + $0x7c] sm:$0xf] %vm770_vm4, %v957_v31  ;;  %v556_v37 = vmax.f32 %v455_v33, 0.0 }
  0xe8   :  { %v353_v38 = vpop.f32.mrf.mxu0  ;;  %v457_v39 = vpop.f32.mrf.mxu1 }
  0xe9   :  { %v932_v40 = vpack.c.bf16 %v530_v36, %v530_v36  ;;  %v354_v41 = vadd.f32 %v1326_v32, %v353_v38  ;;  %v958_v42 = vpack.c.bf16 %v556_v37, %v556_v37  ;;  %v458_v43 = vadd.f32 %v1326_v32, %v457_v39 }
  0xea   :  { %v1021_v44 = vpop.f32.mrf.mxu0  ;;  %v1073_v45 = vpop.f32.mrf.mxu1 }
  0xeb   :  { %777 = vst.msk [vmem:[%s1576_s3 + $0x18] sm:$0xf] %vm770_vm4, %v932_v40  ;;  %v531_v46 = vmax.f32 %v354_v41, 0.0  ;;  %803 = vst.msk [vmem:[%s1576_s3 + $0x80] sm:$0xf] %vm770_vm4, %v958_v42  ;;  %v557_v47 = vmax.f32 %v458_v43, 0.0 }
  0xec   :  { %v358_v48 = vpop.f32.mrf.mxu0  ;;  %v462_v49 = vpop.f32.mrf.mxu1 }
  0xed   :  { %v933_v50 = vpack.c.bf16 %v531_v46, %v531_v46  ;;  %v359_v51 = vadd.f32 %v1326_v32, %v358_v48  ;;  %v959_v52 = vpack.c.bf16 %v557_v47, %v557_v47  ;;  %v463_v53 = vadd.f32 %v1326_v32, %v462_v49 }
  0xee   :  { %v1024_v54 = vpop.f32.mrf.mxu0  ;;  %v1076_v55 = vpop.f32.mrf.mxu1 }
  0xef   :  { %778 = vst.msk [vmem:[%s1576_s3 + $0x1c] sm:$0xf] %vm770_vm4, %v933_v50  ;;  %v532_v56 = vmax.f32 %v359_v51, 0.0  ;;  %804 = vst.msk [vmem:[%s1576_s3 + $0x84] sm:$0xf] %vm770_vm4, %v959_v52  ;;  %v558_v57 = vmax.f32 %v463_v53, 0.0 }
  0xf0   :  { %v361_v58 = vpop.f32.mrf.mxu0  ;;  %v465_v59 = vpop.f32.mrf.mxu1 }
  0xf1   :  { %v934_v60 = vpack.c.bf16 %v532_v56, %v532_v56  ;;  %v362_v61 = vadd.f32 %v1326_v32, %v361_v58  ;;  %v960_v62 = vpack.c.bf16 %v558_v57, %v558_v57  ;;  %v466_v63 = vadd.f32 %v1326_v32, %v465_v59 }
  0xf2   :  { %v1025_v0 = vpop.f32.mrf.mxu0  ;;  %v1077_v1 = vpop.f32.mrf.mxu1 }
  0xf3   :  { %779 = vst.msk [vmem:[%s1576_s3 + $0x20] sm:$0xf] %vm770_vm4, %v934_v60  ;;  %v533_v2 = vmax.f32 %v362_v61, 0.0  ;;  %805 = vst.msk [vmem:[%s1576_s3 + $0x88] sm:$0xf] %vm770_vm4, %v960_v62  ;;  %v559_v3 = vmax.f32 %v466_v63, 0.0 }
  0xf4   :  { %v366_v4 = vpop.f32.mrf.mxu0  ;;  %v470_v5 = vpop.f32.mrf.mxu1 }
  0xf5   :  { %v935_v6 = vpack.c.bf16 %v533_v2, %v533_v2  ;;  %v367_v7 = vadd.f32 %v1326_v32, %v366_v4  ;;  %v961_v8 = vpack.c.bf16 %v559_v3, %v559_v3  ;;  %v471_v9 = vadd.f32 %v1326_v32, %v470_v5 }
  0xf6   :  { %v1028_v10 = vpop.f32.mrf.mxu0  ;;  %v1080_v11 = vpop.f32.mrf.mxu1 }
  0xf7   :  { %780 = vst.msk [vmem:[%s1576_s3 + $0x24] sm:$0xf] %vm770_vm4, %v935_v6  ;;  %v534_v12 = vmax.f32 %v367_v7, 0.0  ;;  %806 = vst.msk [vmem:[%s1576_s3 + $0x8c] sm:$0xf] %vm770_vm4, %v961_v8  ;;  %v560_v13 = vmax.f32 %v471_v9, 0.0 }
  0xf8   :  { %v369_v14 = vpop.f32.mrf.mxu0  ;;  %v473_v15 = vpop.f32.mrf.mxu1 }
  0xf9   :  { %v936_v16 = vpack.c.bf16 %v534_v12, %v534_v12  ;;  %v370_v17 = vadd.f32 %v1326_v32, %v369_v14  ;;  %v962_v18 = vpack.c.bf16 %v560_v13, %v560_v13  ;;  %v474_v19 = vadd.f32 %v1326_v32, %v473_v15 }
  0xfa   :  { %v1029_v20 = vpop.f32.mrf.mxu0  ;;  %v1081_v21 = vpop.f32.mrf.mxu1 }
  0xfb   :  { %781 = vst.msk [vmem:[%s1576_s3 + $0x28] sm:$0xf] %vm770_vm4, %v936_v16  ;;  %v535_v22 = vmax.f32 %v370_v17, 0.0  ;;  %807 = vst.msk [vmem:[%s1576_s3 + $0x90] sm:$0xf] %vm770_vm4, %v962_v18  ;;  %v561_v23 = vmax.f32 %v474_v19, 0.0 }
  0xfc   :  { %v374_v24 = vpop.f32.mrf.mxu0  ;;  %v478_v25 = vpop.f32.mrf.mxu1 }
  0xfd   :  { %v937_v26 = vpack.c.bf16 %v535_v22, %v535_v22  ;;  %v375_v27 = vadd.f32 %v1326_v32, %v374_v24  ;;  %v963_v28 = vpack.c.bf16 %v561_v23, %v561_v23  ;;  %v479_v29 = vadd.f32 %v1326_v32, %v478_v25 }
  0xfe   :  { %v1032_v30 = vpop.f32.mrf.mxu0  ;;  %v1084_v31 = vpop.f32.mrf.mxu1 }
  0xff   :  { %782 = vst.msk [vmem:[%s1576_s3 + $0x2c] sm:$0xf] %vm770_vm4, %v937_v26  ;;  %v536_v33 = vmax.f32 %v375_v27, 0.0  ;;  %808 = vst.msk [vmem:[%s1576_s3 + $0x94] sm:$0xf] %vm770_vm4, %v963_v28  ;;  %v562_v34 = vmax.f32 %v479_v29, 0.0 }
 0x100   :  { %v377_v35 = vpop.f32.mrf.mxu0  ;;  %v481_v36 = vpop.f32.mrf.mxu1 }
 0x101   :  { %v938_v37 = vpack.c.bf16 %v536_v33, %v536_v33  ;;  %v378_v38 = vadd.f32 %v1326_v32, %v377_v35  ;;  %v964_v39 = vpack.c.bf16 %v562_v34, %v562_v34  ;;  %v482_v40 = vadd.f32 %v1326_v32, %v481_v36 }
 0x102   :  { %v1033_v41 = vpop.f32.mrf.mxu0  ;;  %v1085_v42 = vpop.f32.mrf.mxu1 }
 0x103   :  { %783 = vst.msk [vmem:[%s1576_s3 + $0x30] sm:$0xf] %vm770_vm4, %v938_v37  ;;  %v537_v43 = vmax.f32 %v378_v38, 0.0  ;;  %809 = vst.msk [vmem:[%s1576_s3 + $0x98] sm:$0xf] %vm770_vm4, %v964_v39  ;;  %v563_v44 = vmax.f32 %v482_v40, 0.0 }
 0x104   :  { %v382_v45 = vpop.f32.mrf.mxu0  ;;  %v486_v46 = vpop.f32.mrf.mxu1 }
 0x105   :  { %v939_v47 = vpack.c.bf16 %v537_v43, %v537_v43  ;;  %v383_v48 = vadd.f32 %v1326_v32, %v382_v45  ;;  %v965_v49 = vpack.c.bf16 %v563_v44, %v563_v44  ;;  %v487_v50 = vadd.f32 %v1326_v32, %v486_v46 }
 0x106   :  { %v1036_v51 = vpop.f32.mrf.mxu0  ;;  %v1088_v52 = vpop.f32.mrf.mxu1 }
 0x107   :  { %784 = vst.msk [vmem:[%s1576_s3 + $0x34] sm:$0xf] %vm770_vm4, %v939_v47  ;;  %v538_v53 = vmax.f32 %v383_v48, 0.0  ;;  %810 = vst.msk [vmem:[%s1576_s3 + $0x9c] sm:$0xf] %vm770_vm4, %v965_v49  ;;  %v564_v54 = vmax.f32 %v487_v50, 0.0 }
 0x108   :  { %v385_v55 = vpop.f32.mrf.mxu0  ;;  %v489_v56 = vpop.f32.mrf.mxu1 }
 0x109   :  { %v940_v57 = vpack.c.bf16 %v538_v53, %v538_v53  ;;  %v386_v58 = vadd.f32 %v1326_v32, %v385_v55  ;;  %v966_v59 = vpack.c.bf16 %v564_v54, %v564_v54  ;;  %v490_v60 = vadd.f32 %v1326_v32, %v489_v56 }
 0x10a   :  { %v1037_v61 = vpop.f32.mrf.mxu0  ;;  %v1089_v62 = vpop.f32.mrf.mxu1 }
 0x10b   :  { %785 = vst.msk [vmem:[%s1576_s3 + $0x38] sm:$0xf] %vm770_vm4, %v940_v57  ;;  %v539_v63 = vmax.f32 %v386_v58, 0.0  ;;  %811 = vst.msk [vmem:[%s1576_s3 + $0xa0] sm:$0xf] %vm770_vm4, %v966_v59  ;;  %v565_v0 = vmax.f32 %v490_v60, 0.0 }
 0x10c   :  { %v390_v1 = vpop.f32.mrf.mxu0  ;;  %v494_v2 = vpop.f32.mrf.mxu1 }
 0x10d   :  { %v941_v3 = vpack.c.bf16 %v539_v63, %v539_v63  ;;  %v391_v4 = vadd.f32 %v1326_v32, %v390_v1  ;;  %v967_v5 = vpack.c.bf16 %v565_v0, %v565_v0  ;;  %v495_v6 = vadd.f32 %v1326_v32, %v494_v2 }
 0x10e   :  { %v1040_v7 = vpop.f32.mrf.mxu0  ;;  %v1092_v8 = vpop.f32.mrf.mxu1 }
 0x10f   :  { %786 = vst.msk [vmem:[%s1576_s3 + $0x3c] sm:$0xf] %vm770_vm4, %v941_v3  ;;  %v540_v9 = vmax.f32 %v391_v4, 0.0  ;;  %812 = vst.msk [vmem:[%s1576_s3 + $0xa4] sm:$0xf] %vm770_vm4, %v967_v5  ;;  %v566_v10 = vmax.f32 %v495_v6, 0.0 }
 0x110   :  { %v393_v11 = vpop.f32.mrf.mxu0  ;;  %v497_v12 = vpop.f32.mrf.mxu1 }
 0x111   :  { %v942_v13 = vpack.c.bf16 %v540_v9, %v540_v9  ;;  %v394_v14 = vadd.f32 %v1326_v32, %v393_v11  ;;  %v968_v15 = vpack.c.bf16 %v566_v10, %v566_v10  ;;  %v498_v16 = vadd.f32 %v1326_v32, %v497_v12 }
 0x112   :  { %v1041_v17 = vpop.f32.mrf.mxu0  ;;  %v1093_v18 = vpop.f32.mrf.mxu1 }
 0x113   :  { %787 = vst.msk [vmem:[%s1576_s3 + $0x40] sm:$0xf] %vm770_vm4, %v942_v13  ;;  %v541_v19 = vmax.f32 %v394_v14, 0.0  ;;  %813 = vst.msk [vmem:[%s1576_s3 + $0xa8] sm:$0xf] %vm770_vm4, %v968_v15  ;;  %v567_v20 = vmax.f32 %v498_v16, 0.0 }
 0x114   :  { %v398_v21 = vpop.f32.mrf.mxu0  ;;  %v502_v22 = vpop.f32.mrf.mxu1 }
 0x115   :  { %v943_v23 = vpack.c.bf16 %v541_v19, %v541_v19  ;;  %v399_v24 = vadd.f32 %v1326_v32, %v398_v21  ;;  %v969_v25 = vpack.c.bf16 %v567_v20, %v567_v20  ;;  %v503_v26 = vadd.f32 %v1326_v32, %v502_v22 }
 0x116   :  { %v1044_v27 = vpop.f32.mrf.mxu0  ;;  %v1096_v28 = vpop.f32.mrf.mxu1 }
 0x117   :  { %788 = vst.msk [vmem:[%s1576_s3 + $0x44] sm:$0xf] %vm770_vm4, %v943_v23  ;;  %v542_v29 = vmax.f32 %v399_v24, 0.0  ;;  %814 = vst.msk [vmem:[%s1576_s3 + $0xac] sm:$0xf] %vm770_vm4, %v969_v25  ;;  %v568_v30 = vmax.f32 %v503_v26, 0.0 }
 0x118   :  { %v401_v31 = vpop.f32.mrf.mxu0  ;;  %v505_v33 = vpop.f32.mrf.mxu1 }
 0x119   :  { %v944_v34 = vpack.c.bf16 %v542_v29, %v542_v29  ;;  %v402_v35 = vadd.f32 %v1326_v32, %v401_v31  ;;  %v970_v36 = vpack.c.bf16 %v568_v30, %v568_v30  ;;  %v506_v37 = vadd.f32 %v1326_v32, %v505_v33 }
 0x11a   :  { %v1045_v38 = vpop.f32.mrf.mxu0  ;;  %v1097_v39 = vpop.f32.mrf.mxu1 }
 0x11b   :  { %789 = vst.msk [vmem:[%s1576_s3 + $0x48] sm:$0xf] %vm770_vm4, %v944_v34  ;;  %v543_v40 = vmax.f32 %v402_v35, 0.0  ;;  %815 = vst.msk [vmem:[%s1576_s3 + $0xb0] sm:$0xf] %vm770_vm4, %v970_v36  ;;  %v569_v41 = vmax.f32 %v506_v37, 0.0 }
 0x11c   :  { %v406_v42 = vpop.f32.mrf.mxu0  ;;  %v510_v43 = vpop.f32.mrf.mxu1 }
 0x11d   :  { %v945_v44 = vpack.c.bf16 %v543_v40, %v543_v40  ;;  %v407_v45 = vadd.f32 %v1326_v32, %v406_v42  ;;  %v971_v46 = vpack.c.bf16 %v569_v41, %v569_v41  ;;  %v511_v47 = vadd.f32 %v1326_v32, %v510_v43 }
 0x11e   :  { %v1048_v48 = vpop.f32.mrf.mxu0  ;;  %v1100_v49 = vpop.f32.mrf.mxu1 }
 0x11f   :  { %790 = vst.msk [vmem:[%s1576_s3 + $0x4c] sm:$0xf] %vm770_vm4, %v945_v44  ;;  %v544_v50 = vmax.f32 %v407_v45, 0.0  ;;  %816 = vst.msk [vmem:[%s1576_s3 + $0xb4] sm:$0xf] %vm770_vm4, %v971_v46  ;;  %v570_v51 = vmax.f32 %v511_v47, 0.0 }
 0x120   :  { %v409_v52 = vpop.f32.mrf.mxu0  ;;  %v513_v53 = vpop.f32.mrf.mxu1 }
 0x121   :  { %v946_v54 = vpack.c.bf16 %v544_v50, %v544_v50  ;;  %v410_v55 = vadd.f32 %v1326_v32, %v409_v52  ;;  %v972_v56 = vpack.c.bf16 %v570_v51, %v570_v51  ;;  %v514_v57 = vadd.f32 %v1326_v32, %v513_v53 }
 0x122   :  { %v1049_v58 = vpop.f32.mrf.mxu0  ;;  %v1101_v59 = vpop.f32.mrf.mxu1 }
 0x123   :  { %791 = vst.msk [vmem:[%s1576_s3 + $0x50] sm:$0xf] %vm770_vm4, %v946_v54  ;;  %v545_v60 = vmax.f32 %v410_v55, 0.0  ;;  %817 = vst.msk [vmem:[%s1576_s3 + $0xb8] sm:$0xf] %vm770_vm4, %v972_v56  ;;  %v571_v61 = vmax.f32 %v514_v57, 0.0 }
 0x124   :  { %v414_v62 = vpop.f32.mrf.mxu0  ;;  %v518_v63 = vpop.f32.mrf.mxu1 }
 0x125   :  { %v947_v0 = vpack.c.bf16 %v545_v60, %v545_v60  ;;  %v415_v1 = vadd.f32 %v1326_v32, %v414_v62  ;;  %v973_v2 = vpack.c.bf16 %v571_v61, %v571_v61  ;;  %v519_v3 = vadd.f32 %v1326_v32, %v518_v63 }
 0x126   :  { %v1052_v4 = vpop.f32.mrf.mxu0  ;;  %v1104_v5 = vpop.f32.mrf.mxu1 }
 0x127   :  { %792 = vst.msk [vmem:[%s1576_s3 + $0x54] sm:$0xf] %vm770_vm4, %v947_v0  ;;  %v546_v6 = vmax.f32 %v415_v1, 0.0  ;;  %818 = vst.msk [vmem:[%s1576_s3 + $0xbc] sm:$0xf] %vm770_vm4, %v973_v2  ;;  %v572_v7 = vmax.f32 %v519_v3, 0.0 }
 0x128   :  { %v417_v8 = vpop.f32.mrf.mxu0  ;;  %v521_v9 = vpop.f32.mrf.mxu1 }
 0x129   :  { %v948_v10 = vpack.c.bf16 %v546_v6, %v546_v6  ;;  %v418_v11 = vadd.f32 %v1326_v32, %v417_v8  ;;  %v974_v12 = vpack.c.bf16 %v572_v7, %v572_v7 }
 0x12a   :  { %v1053_v13 = vpop.f32.mrf.mxu0  ;;  %v1105_v14 = vpop.f32.mrf.mxu1 }
 0x12b   :  { %793 = vst.msk [vmem:[%s1576_s3 + $0x58] sm:$0xf] %vm770_vm4, %v948_v10  ;;  %v547_v15 = vmax.f32 %v418_v11, 0.0  ;;  %819 = vst.msk [vmem:[%s1576_s3 + $0xc0] sm:$0xf] %vm770_vm4, %v974_v12 }
 0x12c   :  { %v422_v16 = vpop.f32.mrf.mxu0 }
 0x12d   :  { %v949_v17 = vpack.c.bf16 %v547_v15, %v547_v15  ;;  %v423_v18 = vadd.f32 %v1326_v32, %v422_v16 }
 0x12e   :  { %v1056_v19 = vpop.f32.mrf.mxu0 }
 0x12f   :  { %794 = vst.msk [vmem:[%s1576_s3 + $0x5c] sm:$0xf] %vm770_vm4, %v949_v17  ;;  %v548_v20 = vmax.f32 %v423_v18, 0.0 }
 0x130   :  { %v425_v21 = vpop.f32.mrf.mxu0 }
 0x131   :  { %v950_v22 = vpack.c.bf16 %v548_v20, %v548_v20  ;;  %v426_v23 = vadd.f32 %v1326_v32, %v425_v21 }
 0x132   :  { %v1057_v24 = vpop.f32.mrf.mxu0 }
 0x133   :  { %795 = vst.msk [vmem:[%s1576_s3 + $0x60] sm:$0xf] %vm770_vm4, %v950_v22  ;;  %v549_v25 = vmax.f32 %v426_v23, 0.0 }
 0x135   :  { %v951_v26 = vpack.c.bf16 %v549_v25, %v549_v25 }
 0x137   :  { %796 = vst.msk [vmem:[%s1576_s3 + $0x64] sm:$0xf] %vm770_vm4, %v951_v26 }

// kernel: entire_network_forward.5
= control target key start
LH: loop header
LB: loop body
LE: loop exit
PB: predicated region body
PF: predicated region fallthrough
CT: control target
= control target key end

     0   :  { %vm126_vm0 = vcmask 1043456   ;;  %v423_v0 = vmov 0.0   ;;  %vm424_vm1 = vmmov 0   ;;  %vm104_vm2 = vcmask 588800   ;;  %s564_s1 = inlined_call_operand.vmem [shape: bf16[72,16], index: 1, kind: input, shape index: {}]   ;;  %s565_s0 = inlined_call_operand.vmem [shape: bf16[98,72], index: 0, kind: input, shape index: {}]   ;;  %s566_s2 = inlined_call_operand.vmem [shape: f32[1,16], index: 2, kind: input, shape index: {}]   ;;  %s567_s3 = inlined_call_operand.vmem [shape: bf16[98,16], index: 3, kind: output, shape index: {}]  }
   0x1   :  { %361 = vmatprep.subr.bf16.mxu0 %v423_v0  ;;  %v411_v1 = vld [vmem:[%s564_s1 + $0x20] ss:$0 sps:$4 sm:$0xff]   ;;  %399 = vmatprep.subr.bf16.mxu1 %v423_v0  ;;  %v412_v3 = vld [vmem:[%s564_s1 + $0x18] sm:$0xff]   ;;  %v413_v4 = vld [vmem:[%s564_s1 + $0x10] sm:$0xff]   ;;  %vm284_vm3 = vcmask 125952   ;;  %vm297_vm4 = vcmask 122880  }
   0x2   :  { %371 = vmatprep.mubr.msk.bf16.mxu0 %vm424_vm1, %v423_v0  ;;  %387 = vmatprep.mubr.msk.bf16.mxu1 %vm424_vm1, %v423_v0  ;;  %v128_v2 = vsel %vm126_vm0, %v411_v1, 0  ;;  %v414_v5 = vld [vmem:[%s564_s1 + $0x8] sm:$0xff]   ;;  %v415_v6 = vld [vmem:[%s564_s1] sm:$0xff]   ;;  %v420_v11 = vld [vmem:[%s565_s0 + $0x10] sm:$0xff]  }
   0x3   :  { %362 = vmatpush3.bf16.msra.mxu0 %v128_v2  ;;  %404 = vmatpush3.bf16.msra.mxu1 %v128_v2  ;;  %v416_v7 = vld [vmem:[%s565_s0] sm:$0xff]   ;;  %v418_v9 = vld [vmem:[%s565_s0 + $0x8] sm:$0xff]   ;;  %v421_v12 = vld [vmem:[%s565_s0 + $0x30] ss:$0 sps:$4 sm:$0x11]  }
   0x4   :  { %363 = vmatprep.subr.bf16.mxu0 %v423_v0  ;;  %400 = vmatprep.subr.bf16.mxu1 %v423_v0  ;;  %v417_v8 = vld [vmem:[%s565_s0 + $0x20] sm:$0xff]   ;;  %v419_v10 = vld [vmem:[%s565_s0 + $0x28] sm:$0xff]   ;;  %v422_v13 = vld [vmem:[%s565_s0 + $0x18] sm:$0xff]  }
   0x5   :  { %v498_v14 = vld [vmem:[%s566_s2] ss:$0 sm:$0xff] }
   0x7   :  { %364 = vmatpush3.bf16.msra.mxu0 %v412_v3  ;;  %405 = vmatpush3.bf16.msra.mxu1 %v412_v3 }
   0x8   :  { %365 = vmatprep.subr.bf16.mxu0 %v423_v0  ;;  %401 = vmatprep.subr.bf16.mxu1 %v423_v0 }
   0xb   :  { %366 = vmatpush3.bf16.msra.mxu0 %v413_v4  ;;  %406 = vmatpush3.bf16.msra.mxu1 %v413_v4 }
   0xc   :  { %367 = vmatprep.subr.bf16.mxu0 %v423_v0  ;;  %402 = vmatprep.subr.bf16.mxu1 %v423_v0 }
   0xf   :  { %368 = vmatpush3.bf16.msra.mxu0 %v414_v5  ;;  %407 = vmatpush3.bf16.msra.mxu1 %v414_v5 }
  0x10   :  { %369 = vmatprep.subr.bf16.mxu0 %v423_v0  ;;  %403 = vmatprep.subr.bf16.mxu1 %v423_v0 }
  0x13   :  { %370 = vmatpush3.bf16.msra.mxu0 %v415_v6  ;;  %408 = vmatpush3.bf16.msra.mxu1 %v415_v6 }
  0x16   :  { %372 = vmatmul.mubr.msk.bf16.vlgmr.msra.gmra.mxu0 %vm104_vm2, %v416_v7  ;;  %388 = vmatmul.mubr.msk.bf16.vlgmr.msra.gmra.mxu1 %vm104_vm2, %v417_v8 }
  0x17   :  { %375 = vmatprep.mubr.msk.bf16.mxu0 %vm424_vm1, %v423_v0  ;;  %391 = vmatprep.mubr.msk.bf16.mxu1 %vm424_vm1, %v423_v0 }
  0x1e   :  { %376 = vmatmul.mubr.msk.bf16.gmra.mxu0 %vm104_vm2, %v418_v9  ;;  %392 = vmatmul.mubr.msk.bf16.gmra.mxu1 %vm104_vm2, %v419_v10 }
  0x1f   :  { %379 = vmatprep.mubr.msk.bf16.mxu0 %vm424_vm1, %v423_v0  ;;  %395 = vmatprep.mubr.msk.bf16.mxu1 %vm424_vm1, %v423_v0 }
  0x26   :  { %380 = vmatmul.mubr.msk.bf16.gmra.mxu0 %vm104_vm2, %v420_v11  ;;  %396 = vmatmul.mubr.msk.bf16.gmra.mxu1 %vm104_vm2, %v421_v12 }
  0x27   :  { %383 = vmatprep.mubr.msk.bf16.mxu0 %vm424_vm1, %v423_v0 }
  0x2e   :  { %384 = vmatmul.mubr.msk.bf16.gmra.mxu0 %vm104_vm2, %v422_v13 }
  0xd6   :  { %v164_v15 = vpop.f32.mrf.mxu0  ;;  %v196_v16 = vpop.f32.mrf.mxu1 }
  0xd7   :  { %v165_v17 = vadd.f32 %v498_v14, %v164_v15  ;;  %v197_v18 = vadd.f32 %v498_v14, %v196_v16 }
  0xd8   :  { %v373_v19 = vpop.f32.mrf.mxu0  ;;  %v389_v20 = vpop.f32.mrf.mxu1 }
  0xd9   :  { %v218_v21 = vmax.f32 %v165_v17, 0.0  ;;  %v226_v22 = vmax.f32 %v197_v18, 0.0 }
  0xda   :  { %v167_v23 = vpop.f32.mrf.mxu0  ;;  %v199_v24 = vpop.f32.mrf.mxu1 }
  0xdb   :  { %v336_v25 = vpack.c.bf16 %v218_v21, %v218_v21  ;;  %v168_v26 = vadd.f32 %v498_v14, %v167_v23  ;;  %v344_v27 = vpack.c.bf16 %v226_v22, %v226_v22  ;;  %v200_v28 = vadd.f32 %v498_v14, %v199_v24 }
  0xdc   :  { %v374_v29 = vpop.f32.mrf.mxu0  ;;  %v390_v30 = vpop.f32.mrf.mxu1 }
  0xdd   :  { %285 = vst.msk [vmem:[%s567_s3] sm:$0xf] %vm284_vm3, %v336_v25  ;;  %v219_v31 = vmax.f32 %v168_v26, 0.0  ;;  %293 = vst.msk [vmem:[%s567_s3 + $0x20] sm:$0xf] %vm284_vm3, %v344_v27  ;;  %v227_v32 = vmax.f32 %v200_v28, 0.0 }
  0xde   :  { %v172_v33 = vpop.f32.mrf.mxu0  ;;  %v204_v34 = vpop.f32.mrf.mxu1 }
  0xdf   :  { %v337_v35 = vpack.c.bf16 %v219_v31, %v219_v31  ;;  %v173_v36 = vadd.f32 %v498_v14, %v172_v33  ;;  %v345_v37 = vpack.c.bf16 %v227_v32, %v227_v32  ;;  %v205_v38 = vadd.f32 %v498_v14, %v204_v34 }
  0xe0   :  { %v377_v39 = vpop.f32.mrf.mxu0  ;;  %v393_v40 = vpop.f32.mrf.mxu1 }
  0xe1   :  { %286 = vst.msk [vmem:[%s567_s3 + $0x4] sm:$0xf] %vm284_vm3, %v337_v35  ;;  %v220_v41 = vmax.f32 %v173_v36, 0.0  ;;  %294 = vst.msk [vmem:[%s567_s3 + $0x24] sm:$0xf] %vm284_vm3, %v345_v37  ;;  %v228_v42 = vmax.f32 %v205_v38, 0.0 }
  0xe2   :  { %v175_v43 = vpop.f32.mrf.mxu0  ;;  %v207_v44 = vpop.f32.mrf.mxu1 }
  0xe3   :  { %v338_v45 = vpack.c.bf16 %v220_v41, %v220_v41  ;;  %v176_v46 = vadd.f32 %v498_v14, %v175_v43  ;;  %v346_v47 = vpack.c.bf16 %v228_v42, %v228_v42  ;;  %v208_v48 = vadd.f32 %v498_v14, %v207_v44 }
  0xe4   :  { %v378_v49 = vpop.f32.mrf.mxu0  ;;  %v394_v50 = vpop.f32.mrf.mxu1 }
  0xe5   :  { %287 = vst.msk [vmem:[%s567_s3 + $0x8] sm:$0xf] %vm284_vm3, %v338_v45  ;;  %v221_v51 = vmax.f32 %v176_v46, 0.0  ;;  %295 = vst.msk [vmem:[%s567_s3 + $0x28] sm:$0xf] %vm284_vm3, %v346_v47  ;;  %v229_v52 = vmax.f32 %v208_v48, 0.0 }
  0xe6   :  { %v180_v53 = vpop.f32.mrf.mxu0  ;;  %v212_v54 = vpop.f32.mrf.mxu1 }
  0xe7   :  { %v339_v55 = vpack.c.bf16 %v221_v51, %v221_v51  ;;  %v181_v56 = vadd.f32 %v498_v14, %v180_v53  ;;  %v347_v57 = vpack.c.bf16 %v229_v52, %v229_v52  ;;  %v213_v58 = vadd.f32 %v498_v14, %v212_v54 }
  0xe8   :  { %v381_v59 = vpop.f32.mrf.mxu0  ;;  %v397_v60 = vpop.f32.mrf.mxu1 }
  0xe9   :  { %288 = vst.msk [vmem:[%s567_s3 + $0xc] sm:$0xf] %vm284_vm3, %v339_v55  ;;  %v222_v61 = vmax.f32 %v181_v56, 0.0  ;;  %296 = vst.msk [vmem:[%s567_s3 + $0x2c] sm:$0xf] %vm284_vm3, %v347_v57  ;;  %v230_v62 = vmax.f32 %v213_v58, 0.0 }
  0xea   :  { %v183_v63 = vpop.f32.mrf.mxu0  ;;  %v215_v0 = vpop.f32.mrf.mxu1 }
  0xeb   :  { %v340_v1 = vpack.c.bf16 %v222_v61, %v222_v61  ;;  %v184_v2 = vadd.f32 %v498_v14, %v183_v63  ;;  %v348_v3 = vpack.c.bf16 %v230_v62, %v230_v62 }
  0xec   :  { %v382_v4 = vpop.f32.mrf.mxu0  ;;  %v398_v5 = vpop.f32.mrf.mxu1 }
  0xed   :  { %289 = vst.msk [vmem:[%s567_s3 + $0x10] sm:$0xf] %vm284_vm3, %v340_v1  ;;  %v223_v6 = vmax.f32 %v184_v2, 0.0 }
  0xee   :  { %298 = vst.msk [vmem:[%s567_s3 + $0x30] sm:$0x1] %vm297_vm4, %v348_v3  ;;  %v188_v7 = vpop.f32.mrf.mxu0 }
  0xef   :  { %v341_v8 = vpack.c.bf16 %v223_v6, %v223_v6  ;;  %v189_v9 = vadd.f32 %v498_v14, %v188_v7 }
  0xf0   :  { %v385_v10 = vpop.f32.mrf.mxu0 }
  0xf1   :  { %290 = vst.msk [vmem:[%s567_s3 + $0x14] sm:$0xf] %vm284_vm3, %v341_v8  ;;  %v224_v11 = vmax.f32 %v189_v9, 0.0 }
  0xf2   :  { %v191_v12 = vpop.f32.mrf.mxu0 }
  0xf3   :  { %v342_v13 = vpack.c.bf16 %v224_v11, %v224_v11  ;;  %v192_v15 = vadd.f32 %v498_v14, %v191_v12 }
  0xf4   :  { %v386_v16 = vpop.f32.mrf.mxu0 }
  0xf5   :  { %291 = vst.msk [vmem:[%s567_s3 + $0x18] sm:$0xf] %vm284_vm3, %v342_v13  ;;  %v225_v17 = vmax.f32 %v192_v15, 0.0 }
  0xf7   :  { %v343_v18 = vpack.c.bf16 %v225_v17, %v225_v17 }
  0xf9   :  { %292 = vst.msk [vmem:[%s567_s3 + $0x1c] sm:$0xf] %vm284_vm3, %v343_v18 }

// kernel: entire_network_forward.6
= control target key start
LH: loop header
LB: loop body
LE: loop exit
PB: predicated region body
PF: predicated region fallthrough
CT: control target
= control target key end

     0   :  { %v259_v0 = vmov 0   ;;  %vm116_vm0 = vcmask 130048   ;;  %vm192_vm1 = vcmask 257024   ;;  %s338_s1 = inlined_call_operand.vmem [shape: bf16[144,32], index: 1, kind: input, shape index: {}]   ;;  %s339_s0 = inlined_call_operand.vmem [shape: bf16[32,144], index: 0, kind: input, shape index: {}]   ;;  %s340_s2 = inlined_call_operand.vmem [shape: f32[1,32], index: 2, kind: input, shape index: {}]   ;;  %s341_s3 = inlined_call_operand.vmem [shape: bf16[32,32], index: 3, kind: output, shape index: {}]  }
   0x1   :  { %123 = vmatprep.subr.bf16.mxu0 %v259_v0  ;;  %225 = vmatprep.subr.bf16.mxu1 %v259_v0  ;;  %v244_v1 = vld [vmem:[%s338_s1 + $0x38] sm:$0xff]   ;;  %v245_v2 = vld [vmem:[%s338_s1 + $0x30] sm:$0xff]   ;;  %v246_v3 = vld [vmem:[%s338_s1 + $0x28] sm:$0xff]  }
   0x2   :  { %124 = vmatpush1.bf16.msra.mxu0 %v244_v1  ;;  %234 = vmatpush1.bf16.msra.mxu1 %v244_v1  ;;  %v247_v4 = vld [vmem:[%s338_s1 + $0x20] sm:$0xff]   ;;  %v258_v6 = vld [vmem:[%s339_s0 + $0x14] ss:$8 sps:$4 sm:$0xff]   ;;  %v250_v9 = vld [vmem:[%s338_s1 + $0x8] sm:$0xff]  }
   0x3   :  { %125 = vmatprep.subr.bf16.mxu0 %v259_v0  ;;  %226 = vmatprep.subr.bf16.mxu1 %v259_v0  ;;  %v255_v5 = vld [vmem:[%s339_s0 + $0x4] ss:$8 sps:$4 sm:$0xff]   ;;  %v248_v7 = vld [vmem:[%s338_s1 + $0x18] sm:$0xff]   ;;  %v249_v8 = vld [vmem:[%s338_s1 + $0x10] sm:$0xff]  }
   0x4   :  { %215 = vmatprep.mubr.msk.bf16.mxu0 %vm116_vm0, %v255_v5  ;;  %216 = vmatprep.mubr.msk.bf16.mxu1 %vm116_vm0, %v258_v6  ;;  %v251_v10 = vld [vmem:[%s338_s1] sm:$0xff]   ;;  %v256_v13 = vld [vmem:[%s339_s0 + $0x10] ss:$8 sps:$4 sm:$0xff]  }
   0x5   :  { %v252_v11 = vld [vmem:[%s338_s1 + $0x40] sm:$0xff]  }
   0x6   :  { %126 = vmatpush1.bf16.msra.mxu0 %v245_v2  ;;  %235 = vmatpush1.bf16.msra.mxu1 %v245_v2  ;;  %v253_v12 = vld [vmem:[%s339_s0] ss:$8 sps:$4 sm:$0xff]  }
   0x7   :  { %127 = vmatprep.subr.bf16.mxu0 %v259_v0  ;;  %227 = vmatprep.subr.bf16.mxu1 %v259_v0  ;;  %v201_v14 = vld [vmem:[%s340_s2] ss:$0 sm:$0xff] }
   0xa   :  { %128 = vmatpush1.bf16.msra.mxu0 %v246_v3  ;;  %236 = vmatpush1.bf16.msra.mxu1 %v246_v3 }
   0xb   :  { %129 = vmatprep.subr.bf16.mxu0 %v259_v0  ;;  %228 = vmatprep.subr.bf16.mxu1 %v259_v0 }
   0xe   :  { %130 = vmatpush1.bf16.msra.mxu0 %v247_v4  ;;  %237 = vmatpush1.bf16.msra.mxu1 %v247_v4 }
   0xf   :  { %131 = vmatprep.subr.bf16.mxu0 %v259_v0  ;;  %229 = vmatprep.subr.bf16.mxu1 %v259_v0 }
  0x12   :  { %132 = vmatpush1.bf16.msra.mxu0 %v248_v7  ;;  %238 = vmatpush1.bf16.msra.mxu1 %v248_v7 }
  0x13   :  { %133 = vmatprep.subr.bf16.mxu0 %v259_v0  ;;  %230 = vmatprep.subr.bf16.mxu1 %v259_v0 }
  0x16   :  { %134 = vmatpush1.bf16.msra.mxu0 %v249_v8  ;;  %239 = vmatpush1.bf16.msra.mxu1 %v249_v8 }
  0x17   :  { %135 = vmatprep.subr.bf16.mxu0 %v259_v0  ;;  %231 = vmatprep.subr.bf16.mxu1 %v259_v0 }
  0x1a   :  { %136 = vmatpush1.bf16.msra.mxu0 %v250_v9  ;;  %240 = vmatpush1.bf16.msra.mxu1 %v250_v9 }
  0x1b   :  { %137 = vmatprep.subr.bf16.mxu0 %v259_v0  ;;  %232 = vmatprep.subr.bf16.mxu1 %v259_v0 }
  0x1e   :  { %138 = vmatpush1.bf16.msra.mxu0 %v251_v10  ;;  %241 = vmatpush1.bf16.msra.mxu1 %v251_v10 }
  0x1f   :  { %153 = vmatprep.subr.bf16.mxu0 %v259_v0  ;;  %233 = vmatprep.subr.bf16.mxu1 %v259_v0 }
  0x22   :  { %154 = vmatpush2.bf16.msra.mxu0 %v252_v11  ;;  %242 = vmatpush2.bf16.msra.mxu1 %v252_v11 }
  0x25   :  { %156 = vmatmul.mubr.bf16.vlgmr.msra.gmra.mxu0 %v253_v12  ;;  %164 = vmatmul.mubr.bf16.vlgmr.msra.gmra.mxu1 %v256_v13 }
  0xe5   :  { %v157_v15 = vpop.f32.mrf.mxu0  ;;  %v165_v16 = vpop.f32.mrf.mxu1 }
  0xe6   :  { %v158_v17 = vadd.f32 %v201_v14, %v157_v15  ;;  %v166_v18 = vadd.f32 %v201_v14, %v165_v16 }
  0xe7   :  { %v159_v19 = vpop.f32.mrf.mxu0  ;;  %v167_v20 = vpop.f32.mrf.mxu1 }
  0xe8   :  { %v172_v21 = vmax.f32 %v158_v17, 0.0  ;;  %v174_v22 = vmax.f32 %v166_v18, 0.0 }
  0xe9   :  { %v160_v23 = vpop.f32.mrf.mxu0  ;;  %v168_v24 = vpop.f32.mrf.mxu1 }
  0xea   :  { %v221_v25 = vpack.c.bf16 %v172_v21, %v172_v21  ;;  %v223_v26 = vpack.c.bf16 %v174_v22, %v174_v22  ;;  %v161_v27 = vadd.f32 %v201_v14, %v160_v23  ;;  %v169_v28 = vadd.f32 %v201_v14, %v168_v24 }
  0xeb   :  { %v162_v29 = vpop.f32.mrf.mxu0  ;;  %v170_v30 = vpop.f32.mrf.mxu1 }
  0xec   :  { %193 = vst.msk [vmem:[%s341_s3] sm:$0xf] %vm192_vm1, %v221_v25  ;;  %195 = vst.msk [vmem:[%s341_s3 + $0x8] sm:$0xf] %vm192_vm1, %v223_v26  ;;  %v173_v31 = vmax.f32 %v161_v27, 0.0  ;;  %v175_v32 = vmax.f32 %v169_v28, 0.0 }
  0xee   :  { %v222_v33 = vpack.c.bf16 %v173_v31, %v173_v31  ;;  %v224_v34 = vpack.c.bf16 %v175_v32, %v175_v32 }
  0xf0   :  { %194 = vst.msk [vmem:[%s341_s3 + $0x4] sm:$0xf] %vm192_vm1, %v222_v33  ;;  %196 = vst.msk [vmem:[%s341_s3 + $0xc] sm:$0xf] %vm192_vm1, %v224_v34 }

// kernel: entire_network_forward.7
= control target key start
LH: loop header
LB: loop body
LE: loop exit
PB: predicated region body
PF: predicated region fallthrough
CT: control target
= control target key end

     0   :  { %v931_v1 = vmov 0.0   ;;  %vm932_vm0 = vmmov 0   ;;  %v78_v6 = vlaneseq  ;;  %v933_v10 = vmov 1966171168   ;;  %s1189_s0 = inlined_call_operand.vmem [shape: bf16[4,2,288], index: 0, kind: input, shape index: {}]   ;;  %s1190_s1 = inlined_call_operand.vmem [shape: bf16[288,32], index: 1, kind: input, shape index: {}]   ;;  %s1191_s2 = inlined_call_operand.vmem [shape: f32[1,32], index: 2, kind: input, shape index: {}]   ;;  %s1192_s3 = inlined_call_operand.vmem [shape: bf16[32,16], index: 3, kind: input, shape index: {}]   ;;  %s1193_s4 = inlined_call_operand.vmem [shape: f32[1,16], index: 4, kind: input, shape index: {}]   ;;  %s1194_s5 = inlined_call_operand.hbm [shape: f32[2,16], index: 5, kind: output, shape index: {}]  }
   0x1   :  { %v968_v0 = vld [vmem:[%s1190_s1 + $0x78] sm:$0xff]   ;;  %845 = vmatprep.subr.bf16.mxu1 %v931_v1  ;;  %v974_v2 = vld [vmem:[%s1190_s1 + $0x88] sm:$0xff]   ;;  %849 = vmatprep.mubr.msk.bf16.mxu1 %vm932_vm0, %v931_v1  ;;  %v988_v4 = vld [vmem:[%s1190_s1 + $0x70] sm:$0xff]   ;;  %v76_v11 = vunpack.c.l.s4 %v933_v10  ;;  %vm200_vm1 = vcmask 261120  }
   0x2   :  { %742 = vmatprep.subr.bf16.mxu0 %v968_v0  ;;  %v980_v3 = vld [vmem:[%s1190_s1 + $0x38] sm:$0xff]   ;;  %846 = vmatpush3.bf16.msra.mxu1 %v974_v2  ;;  %v995_v5 = vld [vmem:[%s1190_s1 + $0x80] sm:$0xff]   ;;  %v1001_v7 = vld [vmem:[%s1190_s1 + $0x30] sm:$0xff]   ;;  %v79_v12 = vshrl.u32 %v78_v6, 7 }
   0x3   :  { %743 = vmatpush3.bf16.msra.mxu0 %v980_v3  ;;  %847 = vmatprep.subr.bf16.mxu1 %v931_v1  ;;  %v1006_v8 = vld [vmem:[%s1190_s1 + $0x68] sm:$0xff]   ;;  %v709_v9 = vld.sshfl [vmem:[%s1189_s0] sm:$0x13 pattern:$0x75316420]  ;;  %v77_v15 = vunpack.c.0.s8 %v76_v11  ;;  %v1037_v19 = vld [vmem:[%s1190_s1 + $0x58] sm:$0xff]  }
   0x4   :  { %744 = vmatprep.subr.bf16.mxu0 %v988_v4  ;;  %v1017_v13 = vld [vmem:[%s1190_s1 + $0x28] sm:$0xff]   ;;  %v1023_v14 = vld [vmem:[%s1190_s1 + $0x60] sm:$0xff]   ;;  %v74_v16 = vcombine.high %v709_v9, %v709_v9  ;;  %v1045_v23 = vld [vmem:[%s1190_s1 + $0x18] sm:$0xff]  }
   0x5   :  { %v1025_v17 = vsub.s32 %v77_v15, %v79_v12  ;;  %v1031_v18 = vld [vmem:[%s1190_s1 + $0x20] sm:$0xff]   ;;  %v1051_v24 = vld [vmem:[%s1190_s1 + $0x50] sm:$0xff]   ;;  %v1069_v28 = vld [vmem:[%s1190_s1 + $0x48] sm:$0xff]  }
   0x6   :  { %848 = vmatpush3.bf16.msra.mxu1 %v995_v5  ;;  %v730_v25 = vld.sshfl [vmem:[%s1189_s0 + $0x3] sm:$0x13 pattern:$0x75316420]  ;;  %v1063_v26 = vld [vmem:[%s1190_s1 + $0x10] sm:$0xff]  }
   0x7   :  { %745 = vmatpush3.bf16.msra.mxu0 %v1001_v7  ;;  %767 = vmatprep.subr.bf16.mxu1 %v968_v0  ;;  %v81_v20 = vrot.slane %v709_v9, %v1025_v17  ;;  %v88_v21 = vrot.slane %v74_v16, %v1025_v17  ;;  %v295_v27 = vcombine.high %v730_v25, %v730_v25 }
   0x8   :  { %746 = vmatprep.subr.bf16.mxu0 %v1006_v8 }
   0x9   :  { %v89_v22 = vcombine.high %v81_v20, %v81_v20  ;;  %236 = vmatprep.mubr.bf16.mxu0 %v88_v21  ;;  %v309_v29 = vrot.slane %v295_v27, %v1025_v17 }
   0xb   :  { %747 = vmatpush3.bf16.msra.mxu0 %v1017_v13  ;;  %850 = vmatmul.mubr.msk.bf16.vlgmr.msra.gmra.mxu1 %vm200_vm1, %v89_v22 }
   0xc   :  { %748 = vmatprep.subr.bf16.mxu0 %v1023_v14  ;;  %768 = vmatpush3.bf16.msra.mxu1 %v980_v3 }
   0xd   :  { %769 = vmatprep.subr.bf16.mxu1 %v988_v4 }
   0xf   :  { %749 = vmatpush3.bf16.msra.mxu0 %v1031_v18 }
  0x10   :  { %750 = vmatprep.subr.bf16.mxu0 %v1037_v19 }
  0x13   :  { %751 = vmatpush3.bf16.msra.mxu0 %v1045_v23 }
  0x14   :  { %752 = vmatprep.subr.bf16.mxu0 %v1051_v24 }
  0x15   :  { %10 = vsyncpa [#allocation3], 0  ;;  %770 = vmatpush3.bf16.msra.mxu1 %v1001_v7  ;;  %v1078_v30 = vld [vmem:[%s1190_s1 + $0x8] sm:$0xff]   ;;  %v1084_v31 = vld [vmem:[%s1190_s1 + $0x40] sm:$0xff]   ;;  %348 = vmatprep.mubr.bf16.mxu1 %v309_v29  ;;  %v302_v33 = vrot.slane %v730_v25, %v1025_v17  ;;  %s934_s16 = smov [#allocation2]   ;;  %vm692_vm2 = vcmask 123904  }
  0x16   :  { %771 = vmatprep.subr.bf16.mxu1 %v1006_v8  ;;  %v1092_v32 = vld [vmem:[%s1190_s1] sm:$0xff]   ;;  %v736_v38 = vld.sshfl [vmem:[%s1189_s0 + $0x9] sm:$0x13 pattern:$0x75316420]  ;;  %s700_s17 = sshll.u32 %s934_s16, 4  ;;  %s701_s17 = int_to_ptr.vmem [resolvable:$true] %s700_s17 }
  0x17   :  { %753 = vmatpush3.bf16.msra.mxu0 %v1063_v26  ;;  %v733_v34 = vld.sshfl [vmem:[%s1189_s0 + $0x6] sm:$0x13 pattern:$0x75316420]  ;;  %v310_v36 = vcombine.high %v302_v33, %v302_v33  ;;  %v521_v40 = vcombine.high %v736_v38, %v736_v38  ;;  %v528_v43 = vrot.slane %v736_v38, %v1025_v17  ;;  %v708_v11 = vld [vmem:[%s1191_s2] ss:$0 sm:$0xff]  ;;  %p914_p1 = scmp.lt.s32.totalorder %s701_s17, %s701_s17 }
  0x18   :  { %754 = vmatprep.subr.bf16.mxu0 %v1069_v28  ;;  %v408_v35 = vcombine.high %v733_v34, %v733_v34  ;;  %v415_v39 = vrot.slane %v733_v34, %v1025_v17  ;;  %v907_v45 = vld [vmem:[%s1192_s3 + $0x8] sm:$0xff]   ;;  %v908_v46 = vld [vmem:[%s1192_s3] sm:$0xff]   ;;  %s909_s18 = scalar_lea.vmem %s701_s17, 32 }
  0x19   :  { %772 = vmatpush3.bf16.msra.mxu1 %v1017_v13  ;;  %v535_v42 = vrot.slane %v521_v40, %v1025_v17  ;;  %v536_v44 = vcombine.high %v528_v43, %v528_v43  ;;  %p910_p0 = scmp.ne.s32.totalorder %s701_s17, %s909_s18  ;;  %p915_p2 = scmp.lt.s32.totalorder %s909_s18, %s909_s18 }
  0x1a   :  { %773 = vmatprep.subr.bf16.mxu1 %v1023_v14  ;;  %v422_v37 = vrot.slane %v408_v35, %v1025_v17  ;;  %v423_v41 = vcombine.high %v415_v39, %v415_v39 }
  0x1b   :  { %755 = vmatpush3.bf16.msra.mxu0 %v1078_v30  ;;  %p916_p3 = por %p915_p2, %p914_p1 }
  0x1c   :  { %756 = vmatprep.subr.bf16.mxu0 %v1084_v31 }
  0x1d   :  { %774 = vmatpush3.bf16.msra.mxu1 %v1031_v18  ;;  %p917_p4 = pnand %p916_p3, %p910_p0 }
  0x1e   :  { %775 = vmatprep.subr.bf16.mxu1 %v1037_v19 }
  0x1f   :  { %757 = vmatpush3.bf16.msra.mxu0 %v1092_v32 }
  0x20   :  { %853 = vmatprep.subr.bf16.mxu0 %v931_v1 }
  0x21   :  { %776 = vmatpush3.bf16.msra.mxu1 %v1045_v23 }
  0x22   :  { %237 = vmatmul.mubr.bf16.vlgmr.msra.gmra.mxu0 %v81_v20  ;;  %777 = vmatprep.subr.bf16.mxu1 %v1051_v24 }
  0x23   :  { %854 = vmatpush3.bf16.msra.mxu0 %v974_v2  ;;  %857 = vmatprep.mubr.msk.bf16.mxu0 %vm932_vm0, %v931_v1 }
  0x24   :  { %855 = vmatprep.subr.bf16.mxu0 %v931_v1 }
  0x25   :  { %778 = vmatpush3.bf16.msra.mxu1 %v1063_v26 }
  0x26   :  { %779 = vmatprep.subr.bf16.mxu1 %v1069_v28 }
  0x27   :  { %856 = vmatpush3.bf16.msra.mxu0 %v995_v5 }
  0x28   :  { %792 = vmatprep.subr.bf16.mxu0 %v968_v0 }
  0x29   :  { %780 = vmatpush3.bf16.msra.mxu1 %v1078_v30 }
  0x2a   :  { %858 = vmatmul.mubr.msk.bf16.vlgmr.msra.gmra.mxu0 %vm200_vm1, %v310_v36  ;;  %781 = vmatprep.subr.bf16.mxu1 %v1084_v31 }
  0x2b   :  { %793 = vmatpush3.bf16.msra.mxu0 %v980_v3  ;;  %461 = vmatprep.mubr.bf16.mxu0 %v422_v37  ;;  %v738_v37 = vld [vmem:[%s1193_s4] ss:$0 sm:$0xff] }
  0x2c   :  { %794 = vmatprep.subr.bf16.mxu0 %v988_v4 }
  0x2d   :  { %782 = vmatpush3.bf16.msra.mxu1 %v1092_v32 }
  0x2e   :  { %861 = vmatprep.subr.bf16.mxu1 %v931_v1 }
  0x2f   :  { %795 = vmatpush3.bf16.msra.mxu0 %v1001_v7 }
  0x30   :  { %796 = vmatprep.subr.bf16.mxu0 %v1006_v8  ;;  %349 = vmatmul.mubr.bf16.vlgmr.msra.gmra.mxu1 %v302_v33 }
  0x31   :  { %862 = vmatpush3.bf16.msra.mxu1 %v974_v2  ;;  %865 = vmatprep.mubr.msk.bf16.mxu1 %vm932_vm0, %v931_v1 }
  0x32   :  { %863 = vmatprep.subr.bf16.mxu1 %v931_v1 }
  0x33   :  { %797 = vmatpush3.bf16.msra.mxu0 %v1017_v13 }
  0x34   :  { %798 = vmatprep.subr.bf16.mxu0 %v1023_v14 }
  0x35   :  { %864 = vmatpush3.bf16.msra.mxu1 %v995_v5 }
  0x36   :  { %817 = vmatprep.subr.bf16.mxu1 %v968_v0 }
  0x37   :  { %799 = vmatpush3.bf16.msra.mxu0 %v1031_v18 }
  0x38   :  { %800 = vmatprep.subr.bf16.mxu0 %v1037_v19  ;;  %866 = vmatmul.mubr.msk.bf16.vlgmr.msra.gmra.mxu1 %vm200_vm1, %v423_v41 }
  0x39   :  { %818 = vmatpush3.bf16.msra.mxu1 %v980_v3  ;;  %574 = vmatprep.mubr.bf16.mxu1 %v535_v42 }
  0x3a   :  { %819 = vmatprep.subr.bf16.mxu1 %v988_v4 }
  0x3b   :  { %801 = vmatpush3.bf16.msra.mxu0 %v1045_v23 }
  0x3c   :  { %802 = vmatprep.subr.bf16.mxu0 %v1051_v24 }
  0x3d   :  { %820 = vmatpush3.bf16.msra.mxu1 %v1001_v7 }
  0x3e   :  { %821 = vmatprep.subr.bf16.mxu1 %v1006_v8 }
  0x3f   :  { %803 = vmatpush3.bf16.msra.mxu0 %v1063_v26 }
  0x40   :  { %804 = vmatprep.subr.bf16.mxu0 %v1069_v28 }
  0x41   :  { %822 = vmatpush3.bf16.msra.mxu1 %v1017_v13 }
  0x42   :  { %823 = vmatprep.subr.bf16.mxu1 %v1023_v14 }
  0x43   :  { %805 = vmatpush3.bf16.msra.mxu0 %v1078_v30 }
  0x44   :  { %806 = vmatprep.subr.bf16.mxu0 %v1084_v31 }
  0x45   :  { %824 = vmatpush3.bf16.msra.mxu1 %v1031_v18 }
  0x46   :  { %825 = vmatprep.subr.bf16.mxu1 %v1037_v19 }
  0x47   :  { %807 = vmatpush3.bf16.msra.mxu0 %v1092_v32 }
  0x48   :  { %869 = vmatprep.subr.bf16.mxu0 %v931_v1 }
  0x49   :  { %826 = vmatpush3.bf16.msra.mxu1 %v1045_v23 }
  0x4a   :  { %462 = vmatmul.mubr.bf16.vlgmr.msra.gmra.mxu0 %v415_v39  ;;  %827 = vmatprep.subr.bf16.mxu1 %v1051_v24 }
  0x4b   :  { %870 = vmatpush3.bf16.msra.mxu0 %v974_v2  ;;  %873 = vmatprep.mubr.msk.bf16.mxu0 %vm932_vm0, %v931_v1 }
  0x4c   :  { %871 = vmatprep.subr.bf16.mxu0 %v931_v1 }
  0x4d   :  { %828 = vmatpush3.bf16.msra.mxu1 %v1063_v26 }
  0x4e   :  { %829 = vmatprep.subr.bf16.mxu1 %v1069_v28 }
  0x4f   :  { %872 = vmatpush3.bf16.msra.mxu0 %v995_v5 }
  0x50   :  { %877 = vmatprep.subr.bf16.mxu0 %v931_v1 }
  0x51   :  { %830 = vmatpush3.bf16.msra.mxu1 %v1078_v30 }
  0x52   :  { %874 = vmatmul.mubr.msk.bf16.vlgmr.msra.gmra.mxu0 %vm200_vm1, %v536_v44  ;;  %831 = vmatprep.subr.bf16.mxu1 %v1084_v31 }
  0x53   :  { %881 = vmatprep.mubr.msk.bf16.mxu0 %vm932_vm0, %v931_v1  ;;  %878 = vmatpush3.bf16.msra.mxu0 %v907_v45 }
  0x54   :  { %879 = vmatprep.subr.bf16.mxu0 %v931_v1 }
  0x55   :  { %832 = vmatpush3.bf16.msra.mxu1 %v1092_v32 }
  0x57   :  { %880 = vmatpush3.bf16.msra.mxu0 %v908_v46 }
  0x58   :  { %575 = vmatmul.mubr.bf16.vlgmr.msra.gmra.mxu1 %v528_v43 }
  0xcb   :  { %v278_v47 = vpop.f32.mrf.mxu1 }
  0xcd   :  { %v851_v48 = vpop.f32.mrf.mxu1 }
  0xcf   :  { %v281_v49 = vpop.f32.mrf.mxu1 }
  0xd1   :  { %v852_v50 = vpop.f32.mrf.mxu1 }
  0xe2   :  { %v758_v51 = vpop.f32.mrf.mxu0 }
  0xe4   :  { %v759_v52 = vpop.f32.mrf.mxu0 }
  0xe5   :  { %v760_v8 = vadd.f32 %v759_v52, %v758_v51 }
  0xe6   :  { %v761_v53 = vpop.f32.mrf.mxu0 }
  0xe7   :  { %v239_v14 = vadd.f32 %v760_v8, %v708_v11 }
  0xe8   :  { %v762_v54 = vpop.f32.mrf.mxu0 }
  0xe9   :  { %v279_v20 = vadd.f32 %v278_v47, %v239_v14 }
  0xea   :  { %v390_v55 = vpop.f32.mrf.mxu0 }
  0xeb   :  { %v284_v26 = vmax.f32 %v279_v20, 0.0 }
  0xec   :  { %v859_v56 = vpop.f32.mrf.mxu0 }
  0xee   :  { %v393_v57 = vpop.f32.mrf.mxu0 }
  0xf0   :  { %v860_v58 = vpop.f32.mrf.mxu0  ;;  %v783_v59 = vpop.f32.mrf.mxu1 }
  0xf2   :  { %v784_v60 = vpop.f32.mrf.mxu1 }
  0xf3   :  { %v785_v6 = vadd.f32 %v784_v60, %v783_v59 }
  0xf4   :  { %v786_v61 = vpop.f32.mrf.mxu1 }
  0xf5   :  { %v351_v12 = vadd.f32 %v785_v6, %v708_v11 }
  0xf6   :  { %v787_v62 = vpop.f32.mrf.mxu1 }
  0xf7   :  { %v391_v17 = vadd.f32 %v390_v55, %v351_v12 }
  0xf8   :  { %v503_v63 = vpop.f32.mrf.mxu1 }
  0xf9   :  { %v396_v23 = vmax.f32 %v391_v17, 0.0 }
  0xfa   :  { %v867_v0 = vpop.f32.mrf.mxu1 }
  0xfb   :  { %v397_v30 = vadd.f32 %v396_v23, %v284_v26 }
  0xfc   :  { %v506_v1 = vpop.f32.mrf.mxu1 }
  0xfe   :  { %v868_v2 = vpop.f32.mrf.mxu1 }
 0x10a   :  { %v808_v3 = vpop.f32.mrf.mxu0 }
 0x10c   :  { %v809_v4 = vpop.f32.mrf.mxu0 }
 0x10d   :  { %v810_v9 = vadd.f32 %v809_v4, %v808_v3 }
 0x10e   :  { %v811_v5 = vpop.f32.mrf.mxu0 }
 0x10f   :  { %v464_v15 = vadd.f32 %v810_v9, %v708_v11 }
 0x110   :  { %v812_v7 = vpop.f32.mrf.mxu0 }
 0x111   :  { %v504_v21 = vadd.f32 %v503_v63, %v464_v15 }
 0x112   :  { %v616_v10 = vpop.f32.mrf.mxu0 }
 0x113   :  { %v509_v27 = vmax.f32 %v504_v21, 0.0 }
 0x114   :  { %v875_v13 = vpop.f32.mrf.mxu0 }
 0x115   :  { %v510_v32 = vadd.f32 %v509_v27, %v397_v30 }
 0x116   :  { %v619_v16 = vpop.f32.mrf.mxu0 }
 0x118   :  { %v876_v18 = vpop.f32.mrf.mxu0  ;;  %v833_v19 = vpop.f32.mrf.mxu1 }
 0x11a   :  { %v834_v22 = vpop.f32.mrf.mxu1 }
 0x11b   :  { %v835_v24 = vadd.f32 %v834_v22, %v833_v19 }
 0x11c   :  { %v836_v25 = vpop.f32.mrf.mxu1 }
 0x11d   :  { %v577_v28 = vadd.f32 %v835_v24, %v708_v11 }
 0x11e   :  { %v837_v29 = vpop.f32.mrf.mxu1 }
 0x11f   :  { %v617_v31 = vadd.f32 %v616_v10, %v577_v28 }
 0x121   :  { %v622_v33 = vmax.f32 %v617_v31, 0.0 }
 0x123   :  { %v623_v34 = vadd.f32 %v622_v33, %v510_v32 }
 0x125   :  { %v624_v35 = vmul.f32 0.25, %v623_v34 }
 0x127   :  { %v625_v36 = vpack.c.bf16 %v624_v35, %v624_v35 }
 0x129   :  { %882 = vmatmul.mubr.msk.bf16.vlgmr.msra.gmra.mxu0 %vm200_vm1, %v625_v36 }
 0x1e9   :  { %v686_v38 = vpop.f32.mrf.mxu0 }
 0x1ea   :  { %v687_v39 = vadd.f32 %v738_v37, %v686_v38 }
 0x1eb   :  { %v883_v40 = vpop.f32.mrf.mxu0 }
 0x1ec   :  { %693 = vst.msk [vmem:[#allocation2] sm:$0x3] %vm692_vm2, %v687_v39 }
 0x1ed   :  { %v689_v41 = vpop.f32.mrf.mxu0 }
 0x1ee   :  { %920 = shalt.err (!%p917_p4)
}
 0x1ef   :  { %703 = dma.vmem_to_hbm [thread:$0]  %s701_s17, 32, %s1194_s5, [#allocation3]   ;;  %v884_v42 = vpop.f32.mrf.mxu0 }
 0x1f0   :  { %929 = dma.done.wait [#allocation3], 32  }
 0x1f1   :  { %930 = vsyncadd [#allocation3], 4294967264 }
 0x1f2   :  { %707 = vsyncpa [#allocation3], 1 }

</bundles_post_ra>
